<compile_context>
chip_gen: v7x
topology: tpu7x:2x2x1
jax: 0.10.0
libtpu: 0.0.40
codegen_flags: <defaults>
</compile_context>

<pallas_src>
import functools

import jax
import jax.numpy as jnp
from jax.experimental import pallas as pl
from jax.experimental.pallas import tpu as pltpu


def decoder_kernel(ie_ref, yh_ref,
                   w1h_ref, w1c_ref, w1e_ref, b1_ref, w2_ref,
                   wih_c_ref, wih_y_ref, b_fold_ref, whh_ref,
                   out_scale_ref, out_off_ref,
                   wfh_ref, wfctx_ref, bf_ref,
                   out_ref,
                   *, B, Tm1, E, D, F):
    ie = ie_ref[...]                  # (B, Tm1, E)
    yh = yh_ref[...]                  # (B, Tm1, F)
    w2 = w2_ref[...]                  # (1, E)
    whh = whh_ref[...]                # (D, 4D), gate-scaled
    out_scale = out_scale_ref[...]    # (1, 4D)
    out_off = out_off_ref[...]        # (1, 4D)

    # ---- Time-invariant precomputes (off the recurrent critical path) ----
    # Encoder part of the attention layer-1 pre-activation (+ b1).
    enc_proj = (jnp.einsum("bte,ef->btf", ie, w1e_ref[...],
                           preferred_element_type=jnp.float32)
                + b1_ref[...])                                  # (B, Tm1, E)
    # Context folded through the (fc ∘ lstm-input) weights:
    #   ctx @ wih_c == attn @ (ie @ wih_c)  ->  precompute ie @ wih_c once.
    ie_gate = jnp.einsum("bte,eg->btg", ie, wih_c_ref[...],
                         preferred_element_type=jnp.float32)    # (B, Tm1, 4D)
    # y_history + bias contribution to the gates (no recurrent dependence).
    if F == 1:   # (B,Tm1,1) * (1,4D) VPU broadcast, no 1-lane MXU op
        y_pre = yh * wih_y_ref[...] + b_fold_ref[...]           # (B, Tm1, 4D)
    else:
        y_pre = (jnp.einsum("btf,fg->btg", yh, wih_y_ref[...],
                            preferred_element_type=jnp.float32)
                 + b_fold_ref[...])                             # (B, Tm1, 4D)

    h = jnp.zeros((B, D), jnp.float32)
    c = jnp.zeros((B, D), jnp.float32)
    attn = jnp.zeros((B, Tm1), jnp.float32)

    # Tm1 is small (8) -> unroll at trace time.
    # TODO(synk): switch to lax.fori_loop with (h, c, attn) carry if T grows.
    for t in range(Tm1):
        # ---- attention over the T-1 encoder steps ----
        if t == 0:
            a = jnp.tanh(enc_proj)                              # h = c = 0
        else:
            hc_proj = (jnp.dot(h, w1h_ref[...],
                               preferred_element_type=jnp.float32)
                       + jnp.dot(c, w1c_ref[...],
                                 preferred_element_type=jnp.float32))
            a = jnp.tanh(enc_proj + hc_proj[:, None, :])        # (B, Tm1, E)
        scores = jnp.sum(a * w2, axis=-1)                       # (B, Tm1)
        # No max-subtraction: |scores| <= ||w2||_1 (tanh-bounded inputs);
        # bound asserted host-side in __main__. Exact reciprocal (not approx).
        es = jnp.exp(scores)
        attn = es * pl.reciprocal(jnp.sum(es, axis=-1, keepdims=True))

        # ---- fused LSTM gate pre-activation, [i|f|g|o] = 4D = 128 lanes ----
        # ctx contribution = attn-weighted sum of precomputed ie_gate rows.
        pre = jnp.sum(attn[:, :, None] * ie_gate, axis=1) + y_pre[:, t, :]
        if t > 0:
            pre = pre + jnp.dot(h, whh, preferred_element_type=jnp.float32)
        # One EUP tanh pass for all four gates: sigmoid for i/f/o, tanh for g
        # (the 0.5 input scale for i/f/o is folded into the weights host-side).
        act = jnp.tanh(pre) * out_scale + out_off               # (B, 4D)
        i_g = act[:, 0 * D:1 * D]
        f_g = act[:, 1 * D:2 * D]
        g_g = act[:, 2 * D:3 * D]
        o_g = act[:, 3 * D:4 * D]
        c = i_g * g_g if t == 0 else f_g * c + i_g * g_g
        h = o_g * jnp.tanh(c)

    # ---- fc_final(cat(hidden, context)); context materialized only here ----
    ctx = jnp.sum(attn[:, :, None] * ie, axis=1)                # (B, E)
    if F == 1:   # transposed final weights -> lane reductions, no 1-wide MXU
        out = (jnp.sum(h * wfh_ref[...], axis=-1, keepdims=True)
               + jnp.sum(ctx * wfctx_ref[...], axis=-1, keepdims=True)
               + bf_ref[...])
    else:
        out = (jnp.dot(h, wfh_ref[...], preferred_element_type=jnp.float32)
               + jnp.dot(ctx, wfctx_ref[...], preferred_element_type=jnp.float32)
               + bf_ref[...])
    out_ref[...] = out


def _fold_weights(p, D, E, F):
    """Host-side, exact algebraic folding / re-layout of the module weights."""
    # Fold fc into the LSTM input weights:
    #   gates = ctx@(wfc_c@wih) + y@(wfc_y@wih) + (bfc@wih + blstm) + h@whh
    wih = p["wih"]                                     # (F, 4D)
    wih_c = p["wfc_c"] @ wih                           # (E, 4D)
    wih_y = p["wfc_y"] @ wih                           # (F, 4D)
    b_fold = p["bfc"] @ wih + p["blstm"]               # (1, 4D)
    whh = p["whh"]                                     # (D, 4D)

    # Fold the 0.5 input scale of the tanh-based sigmoid into the i/f/o gate
    # columns (exact: multiply by a power of two) so the kernel needs a single
    # tanh pass over the fused (B, 4D) pre-activation. PyTorch gate order is
    # i, f, g, o; only g keeps a plain tanh.
    ones = jnp.ones((D,), jnp.float32)
    zeros = jnp.zeros((D,), jnp.float32)
    in_scale = jnp.concatenate([0.5 * ones, 0.5 * ones, ones, 0.5 * ones])
    out_scale = in_scale[None, :]                                    # (1, 4D)
    out_off = jnp.concatenate([0.5 * ones, 0.5 * ones, zeros,
                               0.5 * ones])[None, :]                 # (1, 4D)
    wih_c = wih_c * in_scale
    wih_y = wih_y * in_scale
    whh_s = whh * in_scale
    b_fold = b_fold * in_scale

    if F == 1:   # transposed final weights -> lane reductions inside kernel
        wfh, wfctx = p["wfh"].T, p["wfctx"].T          # (1, D), (1, E)
    else:
        wfh, wfctx = p["wfh"], p["wfctx"]
    # b2 is dropped entirely: softmax is shift invariant.
    return (p["w1h"], p["w1c"], p["w1e"], p["b1"], p["w2"],
            wih_c, wih_y, b_fold, whh_s, out_scale, out_off,
            wfh, wfctx, p["bf"])


def decoder_forward(input_encoded, y_history, p):
    B, Tm1, E = input_encoded.shape
    F = y_history.shape[-1]
    D = p["whh"].shape[0]
    folded = _fold_weights(p, D, E, F)
    kernel = functools.partial(decoder_kernel, B=B, Tm1=Tm1, E=E, D=D, F=F)
    args = (input_encoded, y_history) + folded
    vspec = pl.BlockSpec(memory_space=pltpu.MemorySpace.VMEM)
    # Everything fits comfortably in VMEM on v5e/v6e/v7x -> gridless, untiled.
    # TODO(synk): add a batch grid axis + dimension_semantics=("parallel",)
    # (and/or fuse encoder+decoder into one pallas_call) once B is large enough
    # to shard across the two v7x TensorCores and fill vreg sublanes.
    return pl.pallas_call(
        kernel,
        out_shape=jax.ShapeDtypeStruct((B, F), jnp.float32),
        in_specs=[vspec] * len(args),
        out_specs=vspec,
    )(*args)


def init_params(key, E, D, F):
    """Deterministic parameter init mirroring the PyTorch module's shapes."""
    ks = jax.random.split(key, 12)

    def u(k, shape, fan_in):
        bound = 1.0 / float(fan_in) ** 0.5
        return jax.random.uniform(k, shape, jnp.float32, -bound, bound)

    # attn_layer: Linear(2D+E -> E), Tanh, Linear(E -> 1)
    w1 = u(ks[0], (2 * D + E, E), 2 * D + E)
    b1 = u(ks[1], (1, E), 2 * D + E)
    w2 = u(ks[2], (1, E), E)
    b2 = u(ks[3], (1, 1), E)
    # fc: Linear(E + F -> F); weight.data.normal_() in the PyTorch module
    wfc = jax.random.normal(ks[4], (E + F, F), jnp.float32)
    bfc = u(ks[5], (1, F), E + F)
    # lstm: input_size=F, hidden_size=D; combined bias (b_ih + b_hh)
    wih = u(ks[6], (F, 4 * D), D)
    whh = u(ks[7], (D, 4 * D), D)
    blstm = u(ks[8], (1, 4 * D), D) + u(ks[9], (1, 4 * D), D)
    # fc_final: Linear(D + E -> F)
    wf = u(ks[10], (D + E, F), D + E)
    bf = u(ks[11], (1, F), D + E)

    return dict(
        w1h=w1[:D], w1c=w1[D:2 * D], w1e=w1[2 * D:], b1=b1,
        w2=w2, b2=b2,
        wfc_c=wfc[:E], wfc_y=wfc[E:], bfc=bfc,
        wih=wih, whh=whh, blstm=blstm,
        wfh=wf[:D], wfctx=wf[D:], bf=bf,
    )


def decoder_ref(input_encoded, y_history, p):
    """Pure-JAX reference mirroring the PyTorch forward pass (unfolded)."""
    B, Tm1, E = input_encoded.shape
    F = y_history.shape[-1]
    D = p["whh"].shape[0]
    w1 = jnp.concatenate([p["w1h"], p["w1c"], p["w1e"]], axis=0)
    wfc = jnp.concatenate([p["wfc_c"], p["wfc_y"]], axis=0)
    wf = jnp.concatenate([p["wfh"], p["wfctx"]], axis=0)

    h = jnp.zeros((B, D), jnp.float32)
    c = jnp.zeros((B, D), jnp.float32)
    ctx = jnp.zeros((B, E), jnp.float32)
    for t in range(Tm1):
        hrep = jnp.broadcast_to(h[:, None, :], (B, Tm1, D))
        crep = jnp.broadcast_to(c[:, None, :], (B, Tm1, D))
        x = jnp.concatenate([hrep, crep, input_encoded], axis=2)
        a = jnp.tanh(x.reshape(-1, 2 * D + E) @ w1 + p["b1"])
        scores = (a @ p["w2"].T + p["b2"]).reshape(B, Tm1)
        attn = jax.nn.softmax(scores, axis=1)
        ctx = jnp.einsum("bt,bte->be", attn, input_encoded)
        y_tilde = jnp.concatenate([ctx, y_history[:, t]], axis=1) @ wfc + p["bfc"]
        gates = y_tilde @ p["wih"] + h @ p["whh"] + p["blstm"]
        i_g = jax.nn.sigmoid(gates[:, :D])
        f_g = jax.nn.sigmoid(gates[:, D:2 * D])
        g_g = jnp.tanh(gates[:, 2 * D:3 * D])
        o_g = jax.nn.sigmoid(gates[:, 3 * D:])
        c = f_g * c + i_g * g_g
        h = o_g * jnp.tanh(c)
    return jnp.concatenate([h, ctx], axis=1) @ wf + p["bf"]


if __name__ == "__main__":
    B, E, D, T, F = 2, 32, 32, 9, 1   # encoder_hidden=32, decoder_hidden=32, T=9, out_feats=1
    Tm1 = T - 1

    key = jax.random.PRNGKey(0)
    k_in, k_y, k_p = jax.random.split(key, 3)
    input_encoded = jax.random.normal(k_in, (B, Tm1, E), jnp.float32)
    y_history = jax.random.normal(k_y, (B, Tm1, F), jnp.float32)
    params = init_params(k_p, E, D, F)

    # The kernel's softmax skips the max-subtraction. This is safe because the
    # attention scores are bounded by ||w2||_1 (tanh outputs are in [-1, 1]),
    # so exp() cannot overflow as long as that norm stays far below ~88.
    assert float(jnp.sum(jnp.abs(params["w2"]))) < 80.0, (
        "attention w2 too large for the no-max-subtraction softmax")

    fwd = jax.jit(decoder_forward)
    out = jax.block_until_ready(fwd(input_encoded, y_history, params))

    ref = jax.block_until_ready(decoder_ref(input_encoded, y_history, params))
    assert out.shape == (B, F)
    # Tolerance covers the (exact-in-real-arithmetic) f32 weight folding and the
    # attn-through-ie_gate reassociation; approx reciprocal was removed.
    assert jnp.allclose(out, ref, atol=3e-3, rtol=3e-3), (out, ref)

    print("KERNEL_OK")
</pallas_src>

<mosaic_0001>
module attributes {stable_mosaic.version = 11 : i64} {
  func.func @decoder_kernel(%arg0: memref<2x8x32xf32, #tpu.memory_space<vmem>>, %arg1: memref<2x8x1xf32, #tpu.memory_space<vmem>>, %arg2: memref<32x32xf32, #tpu.memory_space<vmem>>, %arg3: memref<32x32xf32, #tpu.memory_space<vmem>>, %arg4: memref<32x32xf32, #tpu.memory_space<vmem>>, %arg5: memref<1x32xf32, #tpu.memory_space<vmem>>, %arg6: memref<1x32xf32, #tpu.memory_space<vmem>>, %arg7: memref<32x128xf32, #tpu.memory_space<vmem>>, %arg8: memref<1x128xf32, #tpu.memory_space<vmem>>, %arg9: memref<1x128xf32, #tpu.memory_space<vmem>>, %arg10: memref<32x128xf32, #tpu.memory_space<vmem>>, %arg11: memref<1x128xf32, #tpu.memory_space<vmem>>, %arg12: memref<1x128xf32, #tpu.memory_space<vmem>>, %arg13: memref<1x32xf32, #tpu.memory_space<vmem>>, %arg14: memref<1x32xf32, #tpu.memory_space<vmem>>, %arg15: memref<1x1xf32, #tpu.memory_space<vmem>>, %arg16: memref<2x1xf32, #tpu.memory_space<vmem>>) attributes {dimension_semantics = [], scalar_prefetch = 0 : i64, scratch_operands = 0 : i64, tpu.core_type = #tpu.core_type<tc>} {
    %c0 = arith.constant 0 : index
    %c0_0 = arith.constant 0 : index
    %c0_1 = arith.constant 0 : index
    %0 = vector.load %arg0[%c0, %c0_0, %c0_1] : memref<2x8x32xf32, #tpu.memory_space<vmem>>, vector<2x8x32xf32>
    %c0_2 = arith.constant 0 : index
    %c0_3 = arith.constant 0 : index
    %c0_4 = arith.constant 0 : index
    %1 = vector.load %arg1[%c0_2, %c0_3, %c0_4] : memref<2x8x1xf32, #tpu.memory_space<vmem>>, vector<2x8x1xf32>
    %c0_5 = arith.constant 0 : index
    %c0_6 = arith.constant 0 : index
    %2 = vector.load %arg6[%c0_5, %c0_6] : memref<1x32xf32, #tpu.memory_space<vmem>>, vector<1x32xf32>
    %c0_7 = arith.constant 0 : index
    %c0_8 = arith.constant 0 : index
    %3 = vector.load %arg10[%c0_7, %c0_8] : memref<32x128xf32, #tpu.memory_space<vmem>>, vector<32x128xf32>
    %c0_9 = arith.constant 0 : index
    %c0_10 = arith.constant 0 : index
    %4 = vector.load %arg11[%c0_9, %c0_10] : memref<1x128xf32, #tpu.memory_space<vmem>>, vector<1x128xf32>
    %c0_11 = arith.constant 0 : index
    %c0_12 = arith.constant 0 : index
    %5 = vector.load %arg12[%c0_11, %c0_12] : memref<1x128xf32, #tpu.memory_space<vmem>>, vector<1x128xf32>
    %c0_13 = arith.constant 0 : index
    %c0_14 = arith.constant 0 : index
    %6 = vector.load %arg4[%c0_13, %c0_14] : memref<32x32xf32, #tpu.memory_space<vmem>>, vector<32x32xf32>
    "tpu.trace_start"() <{level = 10 : i32, message = "bte,ef->btf"}> : () -> ()
    %cst = arith.constant dense<0.000000e+00> : vector<2x8x32xf32>
    %7 = tpu.matmul %0, %6, %cst {dimension_numbers = #tpu.dot_dimension_numbers<[2], [0], [0, 1], [1], [0, 0, 0, 1, 1, 1], [], []>} : vector<2x8x32xf32>, vector<32x32xf32>, vector<2x8x32xf32> -> vector<2x8x32xf32>
    "tpu.trace_stop"() : () -> ()
    %c0_15 = arith.constant 0 : index
    %c0_16 = arith.constant 0 : index
    %8 = vector.load %arg5[%c0_15, %c0_16] : memref<1x32xf32, #tpu.memory_space<vmem>>, vector<1x32xf32>
    %9 = vector.shape_cast %8 : vector<1x32xf32> to vector<1x1x32xf32>
    %10 = vector.broadcast %9 : vector<1x1x32xf32> to vector<2x8x32xf32>
    %11 = arith.addf %7, %10 : vector<2x8x32xf32>
    %c0_17 = arith.constant 0 : index
    %c0_18 = arith.constant 0 : index
    %12 = vector.load %arg7[%c0_17, %c0_18] : memref<32x128xf32, #tpu.memory_space<vmem>>, vector<32x128xf32>
    "tpu.trace_start"() <{level = 10 : i32, message = "bte,eg->btg"}> : () -> ()
    %cst_19 = arith.constant dense<0.000000e+00> : vector<2x8x128xf32>
    %13 = tpu.matmul %0, %12, %cst_19 {dimension_numbers = #tpu.dot_dimension_numbers<[2], [0], [0, 1], [1], [0, 0, 0, 1, 1, 1], [], []>} : vector<2x8x32xf32>, vector<32x128xf32>, vector<2x8x128xf32> -> vector<2x8x128xf32>
    "tpu.trace_stop"() : () -> ()
    %c0_20 = arith.constant 0 : index
    %c0_21 = arith.constant 0 : index
    %14 = vector.load %arg8[%c0_20, %c0_21] : memref<1x128xf32, #tpu.memory_space<vmem>>, vector<1x128xf32>
    %15 = vector.shape_cast %14 : vector<1x128xf32> to vector<1x1x128xf32>
    %16 = vector.broadcast %1 : vector<2x8x1xf32> to vector<2x8x128xf32>
    %17 = vector.broadcast %15 : vector<1x1x128xf32> to vector<2x8x128xf32>
    %18 = arith.mulf %16, %17 : vector<2x8x128xf32>
    %c0_22 = arith.constant 0 : index
    %c0_23 = arith.constant 0 : index
    %19 = vector.load %arg9[%c0_22, %c0_23] : memref<1x128xf32, #tpu.memory_space<vmem>>, vector<1x128xf32>
    %20 = vector.shape_cast %19 : vector<1x128xf32> to vector<1x1x128xf32>
    %21 = vector.broadcast %20 : vector<1x1x128xf32> to vector<2x8x128xf32>
    %22 = arith.addf %18, %21 : vector<2x8x128xf32>
    %23 = math.tanh %11 : vector<2x8x32xf32>
    %24 = vector.shape_cast %2 : vector<1x32xf32> to vector<1x1x32xf32>
    %25 = vector.broadcast %24 : vector<1x1x32xf32> to vector<2x8x32xf32>
    %26 = arith.mulf %23, %25 : vector<2x8x32xf32>
    %cst_24 = arith.constant dense<0.000000e+00> : vector<2x8xf32>
    %27 = vector.multi_reduction <add>, %26, %cst_24 [2] : vector<2x8x32xf32> to vector<2x8xf32>
    %28 = math.exp %27 : vector<2x8xf32>
    %cst_25 = arith.constant dense<0.000000e+00> : vector<2xf32>
    %29 = vector.multi_reduction <add>, %28, %cst_25 [1] : vector<2x8xf32> to vector<2xf32>
    %30 = vector.shape_cast %29 : vector<2xf32> to vector<2x1xf32>
    %31 = tpu.reciprocal %30 : vector<2x1xf32> -> vector<2x1xf32>
    %32 = vector.broadcast %31 : vector<2x1xf32> to vector<2x8xf32>
    %33 = arith.mulf %28, %32 : vector<2x8xf32>
    %34 = vector.shape_cast %33 : vector<2x8xf32> to vector<2x8x1xf32>
    %35 = vector.broadcast %34 : vector<2x8x1xf32> to vector<2x8x128xf32>
    %36 = arith.mulf %35, %13 : vector<2x8x128xf32>
    %cst_26 = arith.constant dense<0.000000e+00> : vector<2x128xf32>
    %37 = vector.multi_reduction <add>, %36, %cst_26 [1] : vector<2x8x128xf32> to vector<2x128xf32>
    %38 = vector.extract_strided_slice %22 {offsets = [0, 0, 0], sizes = [2, 1, 128], strides = [1, 1, 1]} : vector<2x8x128xf32> to vector<2x1x128xf32>
    %39 = vector.shape_cast %38 : vector<2x1x128xf32> to vector<2x128xf32>
    %40 = arith.addf %37, %39 : vector<2x128xf32>
    %41 = math.tanh %40 : vector<2x128xf32>
    %42 = vector.broadcast %4 : vector<1x128xf32> to vector<2x128xf32>
    %43 = arith.mulf %41, %42 : vector<2x128xf32>
    %44 = vector.broadcast %5 : vector<1x128xf32> to vector<2x128xf32>
    %45 = arith.addf %43, %44 : vector<2x128xf32>
    %46 = vector.extract_strided_slice %45 {offsets = [0, 0], sizes = [2, 32], strides = [1, 1]} : vector<2x128xf32> to vector<2x32xf32>
    %47 = vector.extract_strided_slice %45 {offsets = [0, 64], sizes = [2, 32], strides = [1, 1]} : vector<2x128xf32> to vector<2x32xf32>
    %48 = vector.extract_strided_slice %45 {offsets = [0, 96], sizes = [2, 32], strides = [1, 1]} : vector<2x128xf32> to vector<2x32xf32>
    %49 = arith.mulf %46, %47 : vector<2x32xf32>
    %50 = math.tanh %49 : vector<2x32xf32>
    %51 = arith.mulf %48, %50 : vector<2x32xf32>
    %c0_27 = arith.constant 0 : index
    %c0_28 = arith.constant 0 : index
    %52 = vector.load %arg2[%c0_27, %c0_28] : memref<32x32xf32, #tpu.memory_space<vmem>>, vector<32x32xf32>
    %cst_29 = arith.constant dense<0.000000e+00> : vector<2x32xf32>
    %53 = tpu.matmul %51, %52, %cst_29 {dimension_numbers = #tpu.dot_dimension_numbers<[1], [0], [0], [1], [0, 0, 1, 1], [], []>} : vector<2x32xf32>, vector<32x32xf32>, vector<2x32xf32> -> vector<2x32xf32>
    %c0_30 = arith.constant 0 : index
    %c0_31 = arith.constant 0 : index
    %54 = vector.load %arg3[%c0_30, %c0_31] : memref<32x32xf32, #tpu.memory_space<vmem>>, vector<32x32xf32>
    %cst_32 = arith.constant dense<0.000000e+00> : vector<2x32xf32>
    %55 = tpu.matmul %49, %54, %cst_32 {dimension_numbers = #tpu.dot_dimension_numbers<[1], [0], [0], [1], [0, 0, 1, 1], [], []>} : vector<2x32xf32>, vector<32x32xf32>, vector<2x32xf32> -> vector<2x32xf32>
    %56 = arith.addf %53, %55 : vector<2x32xf32>
    %57 = vector.shape_cast %56 : vector<2x32xf32> to vector<2x1x32xf32>
    %58 = vector.broadcast %57 : vector<2x1x32xf32> to vector<2x8x32xf32>
    %59 = arith.addf %11, %58 : vector<2x8x32xf32>
    %60 = math.tanh %59 : vector<2x8x32xf32>
    %61 = vector.shape_cast %2 : vector<1x32xf32> to vector<1x1x32xf32>
    %62 = vector.broadcast %61 : vector<1x1x32xf32> to vector<2x8x32xf32>
    %63 = arith.mulf %60, %62 : vector<2x8x32xf32>
    %cst_33 = arith.constant dense<0.000000e+00> : vector<2x8xf32>
    %64 = vector.multi_reduction <add>, %63, %cst_33 [2] : vector<2x8x32xf32> to vector<2x8xf32>
    %65 = math.exp %64 : vector<2x8xf32>
    %cst_34 = arith.constant dense<0.000000e+00> : vector<2xf32>
    %66 = vector.multi_reduction <add>, %65, %cst_34 [1] : vector<2x8xf32> to vector<2xf32>
    %67 = vector.shape_cast %66 : vector<2xf32> to vector<2x1xf32>
    %68 = tpu.reciprocal %67 : vector<2x1xf32> -> vector<2x1xf32>
    %69 = vector.broadcast %68 : vector<2x1xf32> to vector<2x8xf32>
    %70 = arith.mulf %65, %69 : vector<2x8xf32>
    %71 = vector.shape_cast %70 : vector<2x8xf32> to vector<2x8x1xf32>
    %72 = vector.broadcast %71 : vector<2x8x1xf32> to vector<2x8x128xf32>
    %73 = arith.mulf %72, %13 : vector<2x8x128xf32>
    %cst_35 = arith.constant dense<0.000000e+00> : vector<2x128xf32>
    %74 = vector.multi_reduction <add>, %73, %cst_35 [1] : vector<2x8x128xf32> to vector<2x128xf32>
    %75 = vector.extract_strided_slice %22 {offsets = [0, 1, 0], sizes = [2, 1, 128], strides = [1, 1, 1]} : vector<2x8x128xf32> to vector<2x1x128xf32>
    %76 = vector.shape_cast %75 : vector<2x1x128xf32> to vector<2x128xf32>
    %77 = arith.addf %74, %76 : vector<2x128xf32>
    %cst_36 = arith.constant dense<0.000000e+00> : vector<2x128xf32>
    %78 = tpu.matmul %51, %3, %cst_36 {dimension_numbers = #tpu.dot_dimension_numbers<[1], [0], [0], [1], [0, 0, 1, 1], [], []>} : vector<2x32xf32>, vector<32x128xf32>, vector<2x128xf32> -> vector<2x128xf32>
    %79 = arith.addf %77, %78 : vector<2x128xf32>
    %80 = math.tanh %79 : vector<2x128xf32>
    %81 = vector.broadcast %4 : vector<1x128xf32> to vector<2x128xf32>
    %82 = arith.mulf %80, %81 : vector<2x128xf32>
    %83 = vector.broadcast %5 : vector<1x128xf32> to vector<2x128xf32>
    %84 = arith.addf %82, %83 : vector<2x128xf32>
    %85 = vector.extract_strided_slice %84 {offsets = [0, 0], sizes = [2, 32], strides = [1, 1]} : vector<2x128xf32> to vector<2x32xf32>
    %86 = vector.extract_strided_slice %84 {offsets = [0, 32], sizes = [2, 32], strides = [1, 1]} : vector<2x128xf32> to vector<2x32xf32>
    %87 = vector.extract_strided_slice %84 {offsets = [0, 64], sizes = [2, 32], strides = [1, 1]} : vector<2x128xf32> to vector<2x32xf32>
    %88 = vector.extract_strided_slice %84 {offsets = [0, 96], sizes = [2, 32], strides = [1, 1]} : vector<2x128xf32> to vector<2x32xf32>
    %89 = arith.mulf %86, %49 : vector<2x32xf32>
    %90 = arith.mulf %85, %87 : vector<2x32xf32>
    %91 = arith.addf %89, %90 : vector<2x32xf32>
    %92 = math.tanh %91 : vector<2x32xf32>
    %93 = arith.mulf %88, %92 : vector<2x32xf32>
    %c0_37 = arith.constant 0 : index
    %c0_38 = arith.constant 0 : index
    %94 = vector.load %arg2[%c0_37, %c0_38] : memref<32x32xf32, #tpu.memory_space<vmem>>, vector<32x32xf32>
    %cst_39 = arith.constant dense<0.000000e+00> : vector<2x32xf32>
    %95 = tpu.matmul %93, %94, %cst_39 {dimension_numbers = #tpu.dot_dimension_numbers<[1], [0], [0], [1], [0, 0, 1, 1], [], []>} : vector<2x32xf32>, vector<32x32xf32>, vector<2x32xf32> -> vector<2x32xf32>
    %c0_40 = arith.constant 0 : index
    %c0_41 = arith.constant 0 : index
    %96 = vector.load %arg3[%c0_40, %c0_41] : memref<32x32xf32, #tpu.memory_space<vmem>>, vector<32x32xf32>
    %cst_42 = arith.constant dense<0.000000e+00> : vector<2x32xf32>
    %97 = tpu.matmul %91, %96, %cst_42 {dimension_numbers = #tpu.dot_dimension_numbers<[1], [0], [0], [1], [0, 0, 1, 1], [], []>} : vector<2x32xf32>, vector<32x32xf32>, vector<2x32xf32> -> vector<2x32xf32>
    %98 = arith.addf %95, %97 : vector<2x32xf32>
    %99 = vector.shape_cast %98 : vector<2x32xf32> to vector<2x1x32xf32>
    %100 = vector.broadcast %99 : vector<2x1x32xf32> to vector<2x8x32xf32>
    %101 = arith.addf %11, %100 : vector<2x8x32xf32>
    %102 = math.tanh %101 : vector<2x8x32xf32>
    %103 = vector.shape_cast %2 : vector<1x32xf32> to vector<1x1x32xf32>
    %104 = vector.broadcast %103 : vector<1x1x32xf32> to vector<2x8x32xf32>
    %105 = arith.mulf %102, %104 : vector<2x8x32xf32>
    %cst_43 = arith.constant dense<0.000000e+00> : vector<2x8xf32>
    %106 = vector.multi_reduction <add>, %105, %cst_43 [2] : vector<2x8x32xf32> to vector<2x8xf32>
    %107 = math.exp %106 : vector<2x8xf32>
    %cst_44 = arith.constant dense<0.000000e+00> : vector<2xf32>
    %108 = vector.multi_reduction <add>, %107, %cst_44 [1] : vector<2x8xf32> to vector<2xf32>
    %109 = vector.shape_cast %108 : vector<2xf32> to vector<2x1xf32>
    %110 = tpu.reciprocal %109 : vector<2x1xf32> -> vector<2x1xf32>
    %111 = vector.broadcast %110 : vector<2x1xf32> to vector<2x8xf32>
    %112 = arith.mulf %107, %111 : vector<2x8xf32>
    %113 = vector.shape_cast %112 : vector<2x8xf32> to vector<2x8x1xf32>
    %114 = vector.broadcast %113 : vector<2x8x1xf32> to vector<2x8x128xf32>
    %115 = arith.mulf %114, %13 : vector<2x8x128xf32>
    %cst_45 = arith.constant dense<0.000000e+00> : vector<2x128xf32>
    %116 = vector.multi_reduction <add>, %115, %cst_45 [1] : vector<2x8x128xf32> to vector<2x128xf32>
    %117 = vector.extract_strided_slice %22 {offsets = [0, 2, 0], sizes = [2, 1, 128], strides = [1, 1, 1]} : vector<2x8x128xf32> to vector<2x1x128xf32>
    %118 = vector.shape_cast %117 : vector<2x1x128xf32> to vector<2x128xf32>
    %119 = arith.addf %116, %118 : vector<2x128xf32>
    %cst_46 = arith.constant dense<0.000000e+00> : vector<2x128xf32>
    %120 = tpu.matmul %93, %3, %cst_46 {dimension_numbers = #tpu.dot_dimension_numbers<[1], [0], [0], [1], [0, 0, 1, 1], [], []>} : vector<2x32xf32>, vector<32x128xf32>, vector<2x128xf32> -> vector<2x128xf32>
    %121 = arith.addf %119, %120 : vector<2x128xf32>
    %122 = math.tanh %121 : vector<2x128xf32>
    %123 = vector.broadcast %4 : vector<1x128xf32> to vector<2x128xf32>
    %124 = arith.mulf %122, %123 : vector<2x128xf32>
    %125 = vector.broadcast %5 : vector<1x128xf32> to vector<2x128xf32>
    %126 = arith.addf %124, %125 : vector<2x128xf32>
    %127 = vector.extract_strided_slice %126 {offsets = [0, 0], sizes = [2, 32], strides = [1, 1]} : vector<2x128xf32> to vector<2x32xf32>
    %128 = vector.extract_strided_slice %126 {offsets = [0, 32], sizes = [2, 32], strides = [1, 1]} : vector<2x128xf32> to vector<2x32xf32>
    %129 = vector.extract_strided_slice %126 {offsets = [0, 64], sizes = [2, 32], strides = [1, 1]} : vector<2x128xf32> to vector<2x32xf32>
    %130 = vector.extract_strided_slice %126 {offsets = [0, 96], sizes = [2, 32], strides = [1, 1]} : vector<2x128xf32> to vector<2x32xf32>
    %131 = arith.mulf %128, %91 : vector<2x32xf32>
    %132 = arith.mulf %127, %129 : vector<2x32xf32>
    %133 = arith.addf %131, %132 : vector<2x32xf32>
    %134 = math.tanh %133 : vector<2x32xf32>
    %135 = arith.mulf %130, %134 : vector<2x32xf32>
    %c0_47 = arith.constant 0 : index
    %c0_48 = arith.constant 0 : index
    %136 = vector.load %arg2[%c0_47, %c0_48] : memref<32x32xf32, #tpu.memory_space<vmem>>, vector<32x32xf32>
    %cst_49 = arith.constant dense<0.000000e+00> : vector<2x32xf32>
    %137 = tpu.matmul %135, %136, %cst_49 {dimension_numbers = #tpu.dot_dimension_numbers<[1], [0], [0], [1], [0, 0, 1, 1], [], []>} : vector<2x32xf32>, vector<32x32xf32>, vector<2x32xf32> -> vector<2x32xf32>
    %c0_50 = arith.constant 0 : index
    %c0_51 = arith.constant 0 : index
    %138 = vector.load %arg3[%c0_50, %c0_51] : memref<32x32xf32, #tpu.memory_space<vmem>>, vector<32x32xf32>
    %cst_52 = arith.constant dense<0.000000e+00> : vector<2x32xf32>
    %139 = tpu.matmul %133, %138, %cst_52 {dimension_numbers = #tpu.dot_dimension_numbers<[1], [0], [0], [1], [0, 0, 1, 1], [], []>} : vector<2x32xf32>, vector<32x32xf32>, vector<2x32xf32> -> vector<2x32xf32>
    %140 = arith.addf %137, %139 : vector<2x32xf32>
    %141 = vector.shape_cast %140 : vector<2x32xf32> to vector<2x1x32xf32>
    %142 = vector.broadcast %141 : vector<2x1x32xf32> to vector<2x8x32xf32>
    %143 = arith.addf %11, %142 : vector<2x8x32xf32>
    %144 = math.tanh %143 : vector<2x8x32xf32>
    %145 = vector.shape_cast %2 : vector<1x32xf32> to vector<1x1x32xf32>
    %146 = vector.broadcast %145 : vector<1x1x32xf32> to vector<2x8x32xf32>
    %147 = arith.mulf %144, %146 : vector<2x8x32xf32>
    %cst_53 = arith.constant dense<0.000000e+00> : vector<2x8xf32>
    %148 = vector.multi_reduction <add>, %147, %cst_53 [2] : vector<2x8x32xf32> to vector<2x8xf32>
    %149 = math.exp %148 : vector<2x8xf32>
    %cst_54 = arith.constant dense<0.000000e+00> : vector<2xf32>
    %150 = vector.multi_reduction <add>, %149, %cst_54 [1] : vector<2x8xf32> to vector<2xf32>
    %151 = vector.shape_cast %150 : vector<2xf32> to vector<2x1xf32>
    %152 = tpu.reciprocal %151 : vector<2x1xf32> -> vector<2x1xf32>
    %153 = vector.broadcast %152 : vector<2x1xf32> to vector<2x8xf32>
    %154 = arith.mulf %149, %153 : vector<2x8xf32>
    %155 = vector.shape_cast %154 : vector<2x8xf32> to vector<2x8x1xf32>
    %156 = vector.broadcast %155 : vector<2x8x1xf32> to vector<2x8x128xf32>
    %157 = arith.mulf %156, %13 : vector<2x8x128xf32>
    %cst_55 = arith.constant dense<0.000000e+00> : vector<2x128xf32>
    %158 = vector.multi_reduction <add>, %157, %cst_55 [1] : vector<2x8x128xf32> to vector<2x128xf32>
    %159 = vector.extract_strided_slice %22 {offsets = [0, 3, 0], sizes = [2, 1, 128], strides = [1, 1, 1]} : vector<2x8x128xf32> to vector<2x1x128xf32>
    %160 = vector.shape_cast %159 : vector<2x1x128xf32> to vector<2x128xf32>
    %161 = arith.addf %158, %160 : vector<2x128xf32>
    %cst_56 = arith.constant dense<0.000000e+00> : vector<2x128xf32>
    %162 = tpu.matmul %135, %3, %cst_56 {dimension_numbers = #tpu.dot_dimension_numbers<[1], [0], [0], [1], [0, 0, 1, 1], [], []>} : vector<2x32xf32>, vector<32x128xf32>, vector<2x128xf32> -> vector<2x128xf32>
    %163 = arith.addf %161, %162 : vector<2x128xf32>
    %164 = math.tanh %163 : vector<2x128xf32>
    %165 = vector.broadcast %4 : vector<1x128xf32> to vector<2x128xf32>
    %166 = arith.mulf %164, %165 : vector<2x128xf32>
    %167 = vector.broadcast %5 : vector<1x128xf32> to vector<2x128xf32>
    %168 = arith.addf %166, %167 : vector<2x128xf32>
    %169 = vector.extract_strided_slice %168 {offsets = [0, 0], sizes = [2, 32], strides = [1, 1]} : vector<2x128xf32> to vector<2x32xf32>
    %170 = vector.extract_strided_slice %168 {offsets = [0, 32], sizes = [2, 32], strides = [1, 1]} : vector<2x128xf32> to vector<2x32xf32>
    %171 = vector.extract_strided_slice %168 {offsets = [0, 64], sizes = [2, 32], strides = [1, 1]} : vector<2x128xf32> to vector<2x32xf32>
    %172 = vector.extract_strided_slice %168 {offsets = [0, 96], sizes = [2, 32], strides = [1, 1]} : vector<2x128xf32> to vector<2x32xf32>
    %173 = arith.mulf %170, %133 : vector<2x32xf32>
    %174 = arith.mulf %169, %171 : vector<2x32xf32>
    %175 = arith.addf %173, %174 : vector<2x32xf32>
    %176 = math.tanh %175 : vector<2x32xf32>
    %177 = arith.mulf %172, %176 : vector<2x32xf32>
    %c0_57 = arith.constant 0 : index
    %c0_58 = arith.constant 0 : index
    %178 = vector.load %arg2[%c0_57, %c0_58] : memref<32x32xf32, #tpu.memory_space<vmem>>, vector<32x32xf32>
    %cst_59 = arith.constant dense<0.000000e+00> : vector<2x32xf32>
    %179 = tpu.matmul %177, %178, %cst_59 {dimension_numbers = #tpu.dot_dimension_numbers<[1], [0], [0], [1], [0, 0, 1, 1], [], []>} : vector<2x32xf32>, vector<32x32xf32>, vector<2x32xf32> -> vector<2x32xf32>
    %c0_60 = arith.constant 0 : index
    %c0_61 = arith.constant 0 : index
    %180 = vector.load %arg3[%c0_60, %c0_61] : memref<32x32xf32, #tpu.memory_space<vmem>>, vector<32x32xf32>
    %cst_62 = arith.constant dense<0.000000e+00> : vector<2x32xf32>
    %181 = tpu.matmul %175, %180, %cst_62 {dimension_numbers = #tpu.dot_dimension_numbers<[1], [0], [0], [1], [0, 0, 1, 1], [], []>} : vector<2x32xf32>, vector<32x32xf32>, vector<2x32xf32> -> vector<2x32xf32>
    %182 = arith.addf %179, %181 : vector<2x32xf32>
    %183 = vector.shape_cast %182 : vector<2x32xf32> to vector<2x1x32xf32>
    %184 = vector.broadcast %183 : vector<2x1x32xf32> to vector<2x8x32xf32>
    %185 = arith.addf %11, %184 : vector<2x8x32xf32>
    %186 = math.tanh %185 : vector<2x8x32xf32>
    %187 = vector.shape_cast %2 : vector<1x32xf32> to vector<1x1x32xf32>
    %188 = vector.broadcast %187 : vector<1x1x32xf32> to vector<2x8x32xf32>
    %189 = arith.mulf %186, %188 : vector<2x8x32xf32>
    %cst_63 = arith.constant dense<0.000000e+00> : vector<2x8xf32>
    %190 = vector.multi_reduction <add>, %189, %cst_63 [2] : vector<2x8x32xf32> to vector<2x8xf32>
    %191 = math.exp %190 : vector<2x8xf32>
    %cst_64 = arith.constant dense<0.000000e+00> : vector<2xf32>
    %192 = vector.multi_reduction <add>, %191, %cst_64 [1] : vector<2x8xf32> to vector<2xf32>
    %193 = vector.shape_cast %192 : vector<2xf32> to vector<2x1xf32>
    %194 = tpu.reciprocal %193 : vector<2x1xf32> -> vector<2x1xf32>
    %195 = vector.broadcast %194 : vector<2x1xf32> to vector<2x8xf32>
    %196 = arith.mulf %191, %195 : vector<2x8xf32>
    %197 = vector.shape_cast %196 : vector<2x8xf32> to vector<2x8x1xf32>
    %198 = vector.broadcast %197 : vector<2x8x1xf32> to vector<2x8x128xf32>
    %199 = arith.mulf %198, %13 : vector<2x8x128xf32>
    %cst_65 = arith.constant dense<0.000000e+00> : vector<2x128xf32>
    %200 = vector.multi_reduction <add>, %199, %cst_65 [1] : vector<2x8x128xf32> to vector<2x128xf32>
    %201 = vector.extract_strided_slice %22 {offsets = [0, 4, 0], sizes = [2, 1, 128], strides = [1, 1, 1]} : vector<2x8x128xf32> to vector<2x1x128xf32>
    %202 = vector.shape_cast %201 : vector<2x1x128xf32> to vector<2x128xf32>
    %203 = arith.addf %200, %202 : vector<2x128xf32>
    %cst_66 = arith.constant dense<0.000000e+00> : vector<2x128xf32>
    %204 = tpu.matmul %177, %3, %cst_66 {dimension_numbers = #tpu.dot_dimension_numbers<[1], [0], [0], [1], [0, 0, 1, 1], [], []>} : vector<2x32xf32>, vector<32x128xf32>, vector<2x128xf32> -> vector<2x128xf32>
    %205 = arith.addf %203, %204 : vector<2x128xf32>
    %206 = math.tanh %205 : vector<2x128xf32>
    %207 = vector.broadcast %4 : vector<1x128xf32> to vector<2x128xf32>
    %208 = arith.mulf %206, %207 : vector<2x128xf32>
    %209 = vector.broadcast %5 : vector<1x128xf32> to vector<2x128xf32>
    %210 = arith.addf %208, %209 : vector<2x128xf32>
    %211 = vector.extract_strided_slice %210 {offsets = [0, 0], sizes = [2, 32], strides = [1, 1]} : vector<2x128xf32> to vector<2x32xf32>
    %212 = vector.extract_strided_slice %210 {offsets = [0, 32], sizes = [2, 32], strides = [1, 1]} : vector<2x128xf32> to vector<2x32xf32>
    %213 = vector.extract_strided_slice %210 {offsets = [0, 64], sizes = [2, 32], strides = [1, 1]} : vector<2x128xf32> to vector<2x32xf32>
    %214 = vector.extract_strided_slice %210 {offsets = [0, 96], sizes = [2, 32], strides = [1, 1]} : vector<2x128xf32> to vector<2x32xf32>
    %215 = arith.mulf %212, %175 : vector<2x32xf32>
    %216 = arith.mulf %211, %213 : vector<2x32xf32>
    %217 = arith.addf %215, %216 : vector<2x32xf32>
    %218 = math.tanh %217 : vector<2x32xf32>
    %219 = arith.mulf %214, %218 : vector<2x32xf32>
    %c0_67 = arith.constant 0 : index
    %c0_68 = arith.constant 0 : index
    %220 = vector.load %arg2[%c0_67, %c0_68] : memref<32x32xf32, #tpu.memory_space<vmem>>, vector<32x32xf32>
    %cst_69 = arith.constant dense<0.000000e+00> : vector<2x32xf32>
    %221 = tpu.matmul %219, %220, %cst_69 {dimension_numbers = #tpu.dot_dimension_numbers<[1], [0], [0], [1], [0, 0, 1, 1], [], []>} : vector<2x32xf32>, vector<32x32xf32>, vector<2x32xf32> -> vector<2x32xf32>
    %c0_70 = arith.constant 0 : index
    %c0_71 = arith.constant 0 : index
    %222 = vector.load %arg3[%c0_70, %c0_71] : memref<32x32xf32, #tpu.memory_space<vmem>>, vector<32x32xf32>
    %cst_72 = arith.constant dense<0.000000e+00> : vector<2x32xf32>
    %223 = tpu.matmul %217, %222, %cst_72 {dimension_numbers = #tpu.dot_dimension_numbers<[1], [0], [0], [1], [0, 0, 1, 1], [], []>} : vector<2x32xf32>, vector<32x32xf32>, vector<2x32xf32> -> vector<2x32xf32>
    %224 = arith.addf %221, %223 : vector<2x32xf32>
    %225 = vector.shape_cast %224 : vector<2x32xf32> to vector<2x1x32xf32>
    %226 = vector.broadcast %225 : vector<2x1x32xf32> to vector<2x8x32xf32>
    %227 = arith.addf %11, %226 : vector<2x8x32xf32>
    %228 = math.tanh %227 : vector<2x8x32xf32>
    %229 = vector.shape_cast %2 : vector<1x32xf32> to vector<1x1x32xf32>
    %230 = vector.broadcast %229 : vector<1x1x32xf32> to vector<2x8x32xf32>
    %231 = arith.mulf %228, %230 : vector<2x8x32xf32>
    %cst_73 = arith.constant dense<0.000000e+00> : vector<2x8xf32>
    %232 = vector.multi_reduction <add>, %231, %cst_73 [2] : vector<2x8x32xf32> to vector<2x8xf32>
    %233 = math.exp %232 : vector<2x8xf32>
    %cst_74 = arith.constant dense<0.000000e+00> : vector<2xf32>
    %234 = vector.multi_reduction <add>, %233, %cst_74 [1] : vector<2x8xf32> to vector<2xf32>
    %235 = vector.shape_cast %234 : vector<2xf32> to vector<2x1xf32>
    %236 = tpu.reciprocal %235 : vector<2x1xf32> -> vector<2x1xf32>
    %237 = vector.broadcast %236 : vector<2x1xf32> to vector<2x8xf32>
    %238 = arith.mulf %233, %237 : vector<2x8xf32>
    %239 = vector.shape_cast %238 : vector<2x8xf32> to vector<2x8x1xf32>
    %240 = vector.broadcast %239 : vector<2x8x1xf32> to vector<2x8x128xf32>
    %241 = arith.mulf %240, %13 : vector<2x8x128xf32>
    %cst_75 = arith.constant dense<0.000000e+00> : vector<2x128xf32>
    %242 = vector.multi_reduction <add>, %241, %cst_75 [1] : vector<2x8x128xf32> to vector<2x128xf32>
    %243 = vector.extract_strided_slice %22 {offsets = [0, 5, 0], sizes = [2, 1, 128], strides = [1, 1, 1]} : vector<2x8x128xf32> to vector<2x1x128xf32>
    %244 = vector.shape_cast %243 : vector<2x1x128xf32> to vector<2x128xf32>
    %245 = arith.addf %242, %244 : vector<2x128xf32>
    %cst_76 = arith.constant dense<0.000000e+00> : vector<2x128xf32>
    %246 = tpu.matmul %219, %3, %cst_76 {dimension_numbers = #tpu.dot_dimension_numbers<[1], [0], [0], [1], [0, 0, 1, 1], [], []>} : vector<2x32xf32>, vector<32x128xf32>, vector<2x128xf32> -> vector<2x128xf32>
    %247 = arith.addf %245, %246 : vector<2x128xf32>
    %248 = math.tanh %247 : vector<2x128xf32>
    %249 = vector.broadcast %4 : vector<1x128xf32> to vector<2x128xf32>
    %250 = arith.mulf %248, %249 : vector<2x128xf32>
    %251 = vector.broadcast %5 : vector<1x128xf32> to vector<2x128xf32>
    %252 = arith.addf %250, %251 : vector<2x128xf32>
    %253 = vector.extract_strided_slice %252 {offsets = [0, 0], sizes = [2, 32], strides = [1, 1]} : vector<2x128xf32> to vector<2x32xf32>
    %254 = vector.extract_strided_slice %252 {offsets = [0, 32], sizes = [2, 32], strides = [1, 1]} : vector<2x128xf32> to vector<2x32xf32>
    %255 = vector.extract_strided_slice %252 {offsets = [0, 64], sizes = [2, 32], strides = [1, 1]} : vector<2x128xf32> to vector<2x32xf32>
    %256 = vector.extract_strided_slice %252 {offsets = [0, 96], sizes = [2, 32], strides = [1, 1]} : vector<2x128xf32> to vector<2x32xf32>
    %257 = arith.mulf %254, %217 : vector<2x32xf32>
    %258 = arith.mulf %253, %255 : vector<2x32xf32>
    %259 = arith.addf %257, %258 : vector<2x32xf32>
    %260 = math.tanh %259 : vector<2x32xf32>
    %261 = arith.mulf %256, %260 : vector<2x32xf32>
    %c0_77 = arith.constant 0 : index
    %c0_78 = arith.constant 0 : index
    %262 = vector.load %arg2[%c0_77, %c0_78] : memref<32x32xf32, #tpu.memory_space<vmem>>, vector<32x32xf32>
    %cst_79 = arith.constant dense<0.000000e+00> : vector<2x32xf32>
    %263 = tpu.matmul %261, %262, %cst_79 {dimension_numbers = #tpu.dot_dimension_numbers<[1], [0], [0], [1], [0, 0, 1, 1], [], []>} : vector<2x32xf32>, vector<32x32xf32>, vector<2x32xf32> -> vector<2x32xf32>
    %c0_80 = arith.constant 0 : index
    %c0_81 = arith.constant 0 : index
    %264 = vector.load %arg3[%c0_80, %c0_81] : memref<32x32xf32, #tpu.memory_space<vmem>>, vector<32x32xf32>
    %cst_82 = arith.constant dense<0.000000e+00> : vector<2x32xf32>
    %265 = tpu.matmul %259, %264, %cst_82 {dimension_numbers = #tpu.dot_dimension_numbers<[1], [0], [0], [1], [0, 0, 1, 1], [], []>} : vector<2x32xf32>, vector<32x32xf32>, vector<2x32xf32> -> vector<2x32xf32>
    %266 = arith.addf %263, %265 : vector<2x32xf32>
    %267 = vector.shape_cast %266 : vector<2x32xf32> to vector<2x1x32xf32>
    %268 = vector.broadcast %267 : vector<2x1x32xf32> to vector<2x8x32xf32>
    %269 = arith.addf %11, %268 : vector<2x8x32xf32>
    %270 = math.tanh %269 : vector<2x8x32xf32>
    %271 = vector.shape_cast %2 : vector<1x32xf32> to vector<1x1x32xf32>
    %272 = vector.broadcast %271 : vector<1x1x32xf32> to vector<2x8x32xf32>
    %273 = arith.mulf %270, %272 : vector<2x8x32xf32>
    %cst_83 = arith.constant dense<0.000000e+00> : vector<2x8xf32>
    %274 = vector.multi_reduction <add>, %273, %cst_83 [2] : vector<2x8x32xf32> to vector<2x8xf32>
    %275 = math.exp %274 : vector<2x8xf32>
    %cst_84 = arith.constant dense<0.000000e+00> : vector<2xf32>
    %276 = vector.multi_reduction <add>, %275, %cst_84 [1] : vector<2x8xf32> to vector<2xf32>
    %277 = vector.shape_cast %276 : vector<2xf32> to vector<2x1xf32>
    %278 = tpu.reciprocal %277 : vector<2x1xf32> -> vector<2x1xf32>
    %279 = vector.broadcast %278 : vector<2x1xf32> to vector<2x8xf32>
    %280 = arith.mulf %275, %279 : vector<2x8xf32>
    %281 = vector.shape_cast %280 : vector<2x8xf32> to vector<2x8x1xf32>
    %282 = vector.broadcast %281 : vector<2x8x1xf32> to vector<2x8x128xf32>
    %283 = arith.mulf %282, %13 : vector<2x8x128xf32>
    %cst_85 = arith.constant dense<0.000000e+00> : vector<2x128xf32>
    %284 = vector.multi_reduction <add>, %283, %cst_85 [1] : vector<2x8x128xf32> to vector<2x128xf32>
    %285 = vector.extract_strided_slice %22 {offsets = [0, 6, 0], sizes = [2, 1, 128], strides = [1, 1, 1]} : vector<2x8x128xf32> to vector<2x1x128xf32>
    %286 = vector.shape_cast %285 : vector<2x1x128xf32> to vector<2x128xf32>
    %287 = arith.addf %284, %286 : vector<2x128xf32>
    %cst_86 = arith.constant dense<0.000000e+00> : vector<2x128xf32>
    %288 = tpu.matmul %261, %3, %cst_86 {dimension_numbers = #tpu.dot_dimension_numbers<[1], [0], [0], [1], [0, 0, 1, 1], [], []>} : vector<2x32xf32>, vector<32x128xf32>, vector<2x128xf32> -> vector<2x128xf32>
    %289 = arith.addf %287, %288 : vector<2x128xf32>
    %290 = math.tanh %289 : vector<2x128xf32>
    %291 = vector.broadcast %4 : vector<1x128xf32> to vector<2x128xf32>
    %292 = arith.mulf %290, %291 : vector<2x128xf32>
    %293 = vector.broadcast %5 : vector<1x128xf32> to vector<2x128xf32>
    %294 = arith.addf %292, %293 : vector<2x128xf32>
    %295 = vector.extract_strided_slice %294 {offsets = [0, 0], sizes = [2, 32], strides = [1, 1]} : vector<2x128xf32> to vector<2x32xf32>
    %296 = vector.extract_strided_slice %294 {offsets = [0, 32], sizes = [2, 32], strides = [1, 1]} : vector<2x128xf32> to vector<2x32xf32>
    %297 = vector.extract_strided_slice %294 {offsets = [0, 64], sizes = [2, 32], strides = [1, 1]} : vector<2x128xf32> to vector<2x32xf32>
    %298 = vector.extract_strided_slice %294 {offsets = [0, 96], sizes = [2, 32], strides = [1, 1]} : vector<2x128xf32> to vector<2x32xf32>
    %299 = arith.mulf %296, %259 : vector<2x32xf32>
    %300 = arith.mulf %295, %297 : vector<2x32xf32>
    %301 = arith.addf %299, %300 : vector<2x32xf32>
    %302 = math.tanh %301 : vector<2x32xf32>
    %303 = arith.mulf %298, %302 : vector<2x32xf32>
    %c0_87 = arith.constant 0 : index
    %c0_88 = arith.constant 0 : index
    %304 = vector.load %arg2[%c0_87, %c0_88] : memref<32x32xf32, #tpu.memory_space<vmem>>, vector<32x32xf32>
    %cst_89 = arith.constant dense<0.000000e+00> : vector<2x32xf32>
    %305 = tpu.matmul %303, %304, %cst_89 {dimension_numbers = #tpu.dot_dimension_numbers<[1], [0], [0], [1], [0, 0, 1, 1], [], []>} : vector<2x32xf32>, vector<32x32xf32>, vector<2x32xf32> -> vector<2x32xf32>
    %c0_90 = arith.constant 0 : index
    %c0_91 = arith.constant 0 : index
    %306 = vector.load %arg3[%c0_90, %c0_91] : memref<32x32xf32, #tpu.memory_space<vmem>>, vector<32x32xf32>
    %cst_92 = arith.constant dense<0.000000e+00> : vector<2x32xf32>
    %307 = tpu.matmul %301, %306, %cst_92 {dimension_numbers = #tpu.dot_dimension_numbers<[1], [0], [0], [1], [0, 0, 1, 1], [], []>} : vector<2x32xf32>, vector<32x32xf32>, vector<2x32xf32> -> vector<2x32xf32>
    %308 = arith.addf %305, %307 : vector<2x32xf32>
    %309 = vector.shape_cast %308 : vector<2x32xf32> to vector<2x1x32xf32>
    %310 = vector.broadcast %309 : vector<2x1x32xf32> to vector<2x8x32xf32>
    %311 = arith.addf %11, %310 : vector<2x8x32xf32>
    %312 = math.tanh %311 : vector<2x8x32xf32>
    %313 = vector.shape_cast %2 : vector<1x32xf32> to vector<1x1x32xf32>
    %314 = vector.broadcast %313 : vector<1x1x32xf32> to vector<2x8x32xf32>
    %315 = arith.mulf %312, %314 : vector<2x8x32xf32>
    %cst_93 = arith.constant dense<0.000000e+00> : vector<2x8xf32>
    %316 = vector.multi_reduction <add>, %315, %cst_93 [2] : vector<2x8x32xf32> to vector<2x8xf32>
    %317 = math.exp %316 : vector<2x8xf32>
    %cst_94 = arith.constant dense<0.000000e+00> : vector<2xf32>
    %318 = vector.multi_reduction <add>, %317, %cst_94 [1] : vector<2x8xf32> to vector<2xf32>
    %319 = vector.shape_cast %318 : vector<2xf32> to vector<2x1xf32>
    %320 = tpu.reciprocal %319 : vector<2x1xf32> -> vector<2x1xf32>
    %321 = vector.broadcast %320 : vector<2x1xf32> to vector<2x8xf32>
    %322 = arith.mulf %317, %321 : vector<2x8xf32>
    %323 = vector.shape_cast %322 : vector<2x8xf32> to vector<2x8x1xf32>
    %324 = vector.broadcast %323 : vector<2x8x1xf32> to vector<2x8x128xf32>
    %325 = arith.mulf %324, %13 : vector<2x8x128xf32>
    %cst_95 = arith.constant dense<0.000000e+00> : vector<2x128xf32>
    %326 = vector.multi_reduction <add>, %325, %cst_95 [1] : vector<2x8x128xf32> to vector<2x128xf32>
    %327 = vector.extract_strided_slice %22 {offsets = [0, 7, 0], sizes = [2, 1, 128], strides = [1, 1, 1]} : vector<2x8x128xf32> to vector<2x1x128xf32>
    %328 = vector.shape_cast %327 : vector<2x1x128xf32> to vector<2x128xf32>
    %329 = arith.addf %326, %328 : vector<2x128xf32>
    %cst_96 = arith.constant dense<0.000000e+00> : vector<2x128xf32>
    %330 = tpu.matmul %303, %3, %cst_96 {dimension_numbers = #tpu.dot_dimension_numbers<[1], [0], [0], [1], [0, 0, 1, 1], [], []>} : vector<2x32xf32>, vector<32x128xf32>, vector<2x128xf32> -> vector<2x128xf32>
    %331 = arith.addf %329, %330 : vector<2x128xf32>
    %332 = math.tanh %331 : vector<2x128xf32>
    %333 = vector.broadcast %4 : vector<1x128xf32> to vector<2x128xf32>
    %334 = arith.mulf %332, %333 : vector<2x128xf32>
    %335 = vector.broadcast %5 : vector<1x128xf32> to vector<2x128xf32>
    %336 = arith.addf %334, %335 : vector<2x128xf32>
    %337 = vector.extract_strided_slice %336 {offsets = [0, 0], sizes = [2, 32], strides = [1, 1]} : vector<2x128xf32> to vector<2x32xf32>
    %338 = vector.extract_strided_slice %336 {offsets = [0, 32], sizes = [2, 32], strides = [1, 1]} : vector<2x128xf32> to vector<2x32xf32>
    %339 = vector.extract_strided_slice %336 {offsets = [0, 64], sizes = [2, 32], strides = [1, 1]} : vector<2x128xf32> to vector<2x32xf32>
    %340 = vector.extract_strided_slice %336 {offsets = [0, 96], sizes = [2, 32], strides = [1, 1]} : vector<2x128xf32> to vector<2x32xf32>
    %341 = arith.mulf %338, %301 : vector<2x32xf32>
    %342 = arith.mulf %337, %339 : vector<2x32xf32>
    %343 = arith.addf %341, %342 : vector<2x32xf32>
    %344 = math.tanh %343 : vector<2x32xf32>
    %345 = arith.mulf %340, %344 : vector<2x32xf32>
    %346 = vector.shape_cast %322 : vector<2x8xf32> to vector<2x8x1xf32>
    %347 = vector.broadcast %346 : vector<2x8x1xf32> to vector<2x8x32xf32>
    %348 = arith.mulf %347, %0 : vector<2x8x32xf32>
    %cst_97 = arith.constant dense<0.000000e+00> : vector<2x32xf32>
    %349 = vector.multi_reduction <add>, %348, %cst_97 [1] : vector<2x8x32xf32> to vector<2x32xf32>
    %c0_98 = arith.constant 0 : index
    %c0_99 = arith.constant 0 : index
    %350 = vector.load %arg13[%c0_98, %c0_99] : memref<1x32xf32, #tpu.memory_space<vmem>>, vector<1x32xf32>
    %351 = vector.broadcast %350 : vector<1x32xf32> to vector<2x32xf32>
    %352 = arith.mulf %345, %351 : vector<2x32xf32>
    %cst_100 = arith.constant dense<0.000000e+00> : vector<2xf32>
    %353 = vector.multi_reduction <add>, %352, %cst_100 [1] : vector<2x32xf32> to vector<2xf32>
    %354 = vector.shape_cast %353 : vector<2xf32> to vector<2x1xf32>
    %c0_101 = arith.constant 0 : index
    %c0_102 = arith.constant 0 : index
    %355 = vector.load %arg14[%c0_101, %c0_102] : memref<1x32xf32, #tpu.memory_space<vmem>>, vector<1x32xf32>
    %356 = vector.broadcast %355 : vector<1x32xf32> to vector<2x32xf32>
    %357 = arith.mulf %349, %356 : vector<2x32xf32>
    %cst_103 = arith.constant dense<0.000000e+00> : vector<2xf32>
    %358 = vector.multi_reduction <add>, %357, %cst_103 [1] : vector<2x32xf32> to vector<2xf32>
    %359 = vector.shape_cast %358 : vector<2xf32> to vector<2x1xf32>
    %360 = arith.addf %354, %359 : vector<2x1xf32>
    %c0_104 = arith.constant 0 : index
    %c0_105 = arith.constant 0 : index
    %361 = vector.load %arg15[%c0_104, %c0_105] : memref<1x1xf32, #tpu.memory_space<vmem>>, vector<1x1xf32>
    %362 = vector.broadcast %361 : vector<1x1xf32> to vector<2x1xf32>
    %363 = arith.addf %360, %362 : vector<2x1xf32>
    %c0_106 = arith.constant 0 : index
    %c0_107 = arith.constant 0 : index
    %364 = vector.load %arg16[%c0_106, %c0_107] : memref<2x1xf32, #tpu.memory_space<vmem>>, vector<2x1xf32>
    tpu.vector_store %arg16[%c0_106, %c0_107], %363 {strides = array<i32>} : memref<2x1xf32, #tpu.memory_space<vmem>>, vector<2x1xf32>,
    return
  }
}

</mosaic_0001>

<bundles_post_ra>
// kernel: decoder_forward.1
= control target key start
LH: loop header
LB: loop body
LE: loop exit
PB: predicated region body
PF: predicated region fallthrough
CT: control target
= control target key end

     0   :  { %vm77_vm0 = vcmask 261120   ;;  %v288_v30 = vlaneseq  ;;  %vm298_vm1 = vcmask 1041409   ;;  %vm301_vm2 = vcmask 58368   ;;  %s3877_s29 = smov 64   ;;  %s4668_s4 = inlined_call_operand.vmem [shape: f32[32,32], index: 4, kind: input, shape index: {}]   ;;  %s4669_s0 = inlined_call_operand.vmem [shape: f32[2,8,32], index: 0, kind: input, shape index: {}]   ;;  %s4670_s5 = inlined_call_operand.vmem [shape: f32[1,32], index: 5, kind: input, shape index: {}]   ;;  %s4671_s6 = inlined_call_operand.vmem [shape: f32[1,32], index: 6, kind: input, shape index: {}]   ;;  %s4672_s7 = inlined_call_operand.vmem [shape: f32[32,128], index: 7, kind: input, shape index: {}]   ;;  %s4673_s1 = inlined_call_operand.vmem [shape: f32[2,8,1], index: 1, kind: input, shape index: {}]   ;;  %s4674_s8 = inlined_call_operand.vmem [shape: f32[1,128], index: 8, kind: input, shape index: {}]   ;;  %s4675_s9 = inlined_call_operand.vmem [shape: f32[1,128], index: 9, kind: input, shape index: {}]   ;;  %s4676_s3 = inlined_call_operand.vmem [shape: f32[32,32], index: 3, kind: input, shape index: {}]   ;;  %s4677_s11 = inlined_call_operand.vmem [shape: f32[1,128], index: 11, kind: input, shape index: {}]   ;;  %s4678_s12 = inlined_call_operand.vmem [shape: f32[1,128], index: 12, kind: input, shape index: {}]   ;;  %s4679_s2 = inlined_call_operand.vmem [shape: f32[32,32], index: 2, kind: input, shape index: {}]   ;;  %s4680_s10 = inlined_call_operand.vmem [shape: f32[32,128], index: 10, kind: input, shape index: {}]   ;;  %s4681_s13 = inlined_call_operand.vmem [shape: f32[1,32], index: 13, kind: input, shape index: {}]   ;;  %s4682_s14 = inlined_call_operand.vmem [shape: f32[1,32], index: 14, kind: input, shape index: {}]   ;;  %s4683_s15 = inlined_call_operand.<no memory space> [shape: f32[1,1], index: 15, kind: input, shape index: {}]   ;;  %s4684_s16 = inlined_call_operand.vmem [shape: f32[2,1], index: 16, kind: output, shape index: {}]  }
   0x1   :  { %4686 = sst [smem:[#allocation3_spill]] %s4668_s4  ;;  %v55_v5 = vld [vmem:[%s4669_s0] sm:$0xff]  ;;  %v56_v7 = vld [vmem:[%s4669_s0 + $0x8] sm:$0xff]  ;;  %v161_v22 = vld [vmem:[%s4672_s7 + $0x10] sm:$0xff]  ;;  %v3873_v40 = vmov 0   ;;  %v3874_v53 = vmov 0.0|0.0  }
   0x2   :  { %s4687_s23 = sld [smem:[#allocation3_spill]]  ;;  %3313 = vmatprep.mubr.msk.f32.mxu0 %vm77_vm0, %v55_v5  ;;  %3324 = vmatprep.mubr.msk.f32.mxu1 %vm77_vm0, %v55_v5  ;;  %v3154_v8 = vld [vmem:[%s4670_s5] ss:$0 sm:$0xff]  ;;  %v160_v21 = vld [vmem:[%s4672_s7 + $0x8] sm:$0xff]  ;;  %v162_v24 = vld [vmem:[%s4672_s7 + $0x18] sm:$0xff]  ;;  %v289_v31 = vand.u32 127, %v288_v30 }
   0x3   :  { %v3999_v13 = vld [vmem:[%s4671_s6] ss:$0 sm:$0xff]  ;;  %v3570_v25 = vpack.c.bf16 %v162_v24, %v161_v22  ;;  %v4018_v32 = vshrl.u32 %v288_v30, 7  ;;  %3723 = vset.pattern.permute.xlu0 %v3873_v40  ;;  %3722 = vset.pattern.permute.xlu1 %v3873_v40  ;;  %v58_v51 = vld [vmem:[%s4673_s1 + $0x8] sm:$0xff]  ;;  %v391_v22 = vld [vmem:[%s4676_s3 + $0x10] sm:$0xff]  ;;  %vm3875_vm3 = vmmov 0  }
   0x4   :  { %v159_v20 = vld [vmem:[%s4672_s7] sm:$0xff]  ;;  %vm3128_vm4 = vcmask 254976   ;;  %vm3106_vm5 = vcmask 261127   ;;  %vm3110_vm6 = vcmask 253952   ;;  %vm3146_vm7 = vcmask 7175  }
   0x5   :  { %v3566_v23 = vpack.c.bf16 %v160_v21, %v159_v20  ;;  %v4021_v33 = vsub.s32 %v289_v31, %v4018_v32  ;;  %v4032_v44 = vsub.s32 0, %v4018_v32  ;;  %v4035_v45 = vsub.s32 1, %v4018_v32  ;;  %v57_v52 = vld [vmem:[%s4673_s1] sm:$0xff]  ;;  %v390_v20 = vld [vmem:[%s4676_s3 + $0x8] sm:$0xff] }
   0x6   :  { %v3159_v63 = vld [vmem:[%s4674_s8] ss:$0 sm:$0xff]  ;;  %vm3148_vm8 = vcmask 0  }
   0x7   :  { %3567 = vmatprep.subr.bf16.mxu1 %v3566_v23 }
   0x8   :  { %v66_v0 = vld [vmem:[%s4687_s23] sm:$0xff]  ;;  %v67_v1 = vld [vmem:[%s4687_s23 + $0x8] sm:$0xff]  ;;  %v68_v2 = vld [vmem:[%s4687_s23 + $0x10] sm:$0xff]  ;;  %3569 = vmatpush3.bf16.msra.mxu1 %v3566_v23 }
   0x9   :  { %v3558_v3 = vpack.c.bf16 %v67_v1, %v66_v0  ;;  %v69_v4 = vld [vmem:[%s4687_s23 + $0x18] sm:$0xff]  ;;  %3571 = vmatprep.subr.bf16.mxu1 %v3570_v25 }
   0xa   :  { %v3562_v6 = vpack.c.bf16 %v69_v4, %v68_v2  ;;  %v392_v23 = vld [vmem:[%s4676_s3 + $0x18] sm:$0xff] }
   0xb   :  { %3559 = vmatprep.subr.bf16.mxu0 %v3558_v3  ;;  %v4077_v24 = vpack.c.bf16 %v392_v23, %v391_v22 }
   0xc   :  { %3561 = vmatpush3.bf16.msra.mxu0 %v3558_v3  ;;  %3573 = vmatpush3.bf16.msra.mxu1 %v3570_v25  ;;  %v4083_v25 = vld [vmem:[%s4677_s11] ss:$0 sm:$0xff] }
   0xd   :  { %3563 = vmatprep.subr.bf16.mxu0 %v3562_v6  ;;  %3586 = vmatprep.subr.bf16.mxu1 %v3874_v53 }
   0xf   :  { %3325 = vmatmul.mubr.msk.f32.vlgmr.msra.gmra.mrb[0].mxu1 %vm77_vm0, %v56_v7 }
  0x10   :  { %3565 = vmatpush3.bf16.msra.mxu0 %v3562_v6 }
  0x11   :  { %3574 = vmatprep.subr.bf16.mxu0 %v3874_v53 }
  0x13   :  { %3314 = vmatmul.mubr.msk.f32.vlgmr.msra.gmra.mrb[0].mxu0 %vm77_vm0, %v56_v7  ;;  %v3160_v7 = vld [vmem:[%s4675_s9] ss:$0 sm:$0xff] }
  0xe2   :  { %v4027_v41 = vpop.f32.mrb[0].mxu1 }
  0xe3   :  { %v4029_v42 = vpop.f32.mrb[1].mxu1 }
  0xe6   :  { %v3315_v9 = vpop.f32.mrb[0].mxu0 }
  0xe7   :  { %v3990_v10 = vadd.f32 %v3315_v9, %v3154_v8  ;;  %v150_v11 = vpop.f32.mrb[1].mxu0 }
  0xe8   :  { %v3992_v12 = vadd.f32 %v3154_v8, %v150_v11 }
  0xe9   :  { %3724 = vtanh.f32 %v3990_v10 }
  0xea   :  { %3726 = vtanh.f32 %v3992_v12 }
  0xf3   :  { %v3725_v14 = vpop.eup %3724 }
  0xf4   :  { %v3727_v15 = vpop.eup %3726  ;;  %v275_v18 = vmul.f32 %v3725_v14, %v3999_v13 }
  0xf5   :  { %v274_v16 = vmul.f32 %v3727_v15, %v3999_v13 }
  0xf6   :  { %v279_v19 = vsel %vm77_vm0, %v275_v18, 0.0 }
  0xf7   :  { %v276_v17 = vsel %vm77_vm0, %v274_v16, 0.0 }
  0xf8   :  { %277 = vadd.xlane.f32.xlu0 %v276_v17 }
  0xfc   :  { %280 = vadd.xlane.f32.xlu0 %v279_v19  ;;  %v389_v19 = vld [vmem:[%s4676_s3] sm:$0xff] }
  0xfd   :  { %v4067_v21 = vpack.c.bf16 %v390_v20, %v389_v19 }
  0xff   :  { %3576 = vmatpush3.bf16.msra.mxu0 %v4067_v21 }
 0x100   :  { %3577 = vmatprep.subr.bf16.mxu0 %v3874_v53 }
 0x103   :  { %3579 = vmatpush3.bf16.msra.mxu0 %v4077_v24 }
 0x104   :  { %3580 = vmatprep.subr.bf16.mxu0 %v3874_v53 }
 0x185   :  { %v278_v26 = vpop.xlane.xlu0 %277 }
 0x186   :  { %v282_v27 = vmul.f32 1.442695, %v278_v26  ;;  %v3876_v26 = vmov 0.0  }
 0x187   :  { %3335 = vmatprep.mubr.msk.f32.mxu0 %vm3875_vm3, %v3876_v26  ;;  %3357 = vmatprep.mubr.msk.f32.mxu1 %vm3875_vm3, %v3876_v26 }
 0x188   :  { %3728 = vpow2.f32 %v282_v27 }
 0x189   :  { %v281_v28 = vpop.xlane.xlu0 %280 }
 0x18a   :  { %v284_v29 = vmul.f32 1.442695, %v281_v28  ;;  %v4093_v28 = vld [vmem:[%s4678_s12] ss:$0 sm:$0xff] }
 0x18c   :  { %3730 = vpow2.f32 %v284_v29 }
 0x192   :  { %v3729_v34 = vpop.eup %3728 }
 0x193   :  { %v293_v36 = vrot.slane %v3729_v34, %v4021_v33 }
 0x196   :  { %v3731_v35 = vpop.eup %3730 }
 0x197   :  { %v297_v37 = vrot.slane %v3731_v35, %v4021_v33 }
 0x199   :  { %v299_v38 = vsel %vm298_vm1, %v297_v37, %v293_v36 }
 0x19a   :  { %v302_v39 = vsel %vm301_vm2, %v299_v38, 0.0 }
 0x19b   :  { %303 = vadd.xlane.f32.xlu1 %v302_v39 }
 0x228   :  { %v304_v43 = vpop.xlane.xlu1 %303 }
 0x229   :  { %3732 = vrcp.f32 %v304_v43 }
 0x233   :  { %v3733_v46 = vpop.eup %3732 }
 0x234   :  { %v314_v47 = vrot.slane %v3733_v46, %v4035_v45  ;;  %v310_v48 = vrot.slane %v3733_v46, %v4032_v44  ;;  %v385_v46 = vld [vmem:[%s4679_s2] sm:$0xff] }
 0x236   :  { %v318_v49 = vmul.f32 %v3731_v35, %v314_v47  ;;  %v317_v50 = vmul.f32 %v3729_v34, %v310_v48  ;;  %v386_v47 = vld [vmem:[%s4679_s2 + $0x8] sm:$0xff]  ;;  %v60_v48 = vld [vmem:[%s4680_s10] sm:$0xff] }
 0x238   :  { %326 = vperm.xlu1 %3722, %v318_v49   ;;  %321 = vperm.xlu0 %3723, %v317_v50   ;;  %v4124_v49 = vpack.c.bf16 %v386_v47, %v385_v46  ;;  %v61_v50 = vld [vmem:[%s4680_s10 + $0x8] sm:$0xff] }
 0x23c   :  { %246 = vperm.xlu1 %3722, %v58_v51   ;;  %v387_v51 = vld [vmem:[%s4679_s2 + $0x10] sm:$0xff] }
 0x240   :  { %241 = vperm.xlu1 %3722, %v57_v52   ;;  %v388_v52 = vld [vmem:[%s4679_s2 + $0x18] sm:$0xff]  ;;  %s3878_s2 = smov 96  }
 0x2b7   :  { %v327_v54 = vpop.permute.xlu1 %326  ;;  %v322_v55 = vpop.permute.xlu0 %321 }
 0x2b8   :  { %v330_v56 = vmul.f32 %v4027_v41, %v327_v54  ;;  %v329_v57 = vmul.f32 %v322_v55, %v4029_v42  ;;  %v4135_v54 = vpack.c.bf16 %v61_v50, %v60_v48  ;;  %v62_v55 = vld [vmem:[%s4680_s10 + $0x10] sm:$0xff] }
 0x2ba   :  { %v337_v58 = vrot.slane %v330_v56, 4  ;;  %v331_v59 = vrot.slane %v329_v57, 4  ;;  %3588 = vmatpush3.bf16.msra.mxu1 %v4135_v54 }
 0x2bb   :  { %v247_v60 = vpop.permute.xlu1 %246  ;;  %3589 = vmatprep.subr.bf16.mxu1 %v3874_v53 }
 0x2bc   :  { %v338_v61 = vadd.f32 %v337_v58, %v330_v56  ;;  %v332_v62 = vadd.f32 %v331_v59, %v329_v57  ;;  %v256_v5 = vmul.f32 %v3159_v63, %v247_v60  ;;  %v63_v56 = vld [vmem:[%s4680_s10 + $0x18] sm:$0xff]  ;;  %v4144_v57 = vpack.c.bf16 %v388_v52, %v387_v51  ;;  %s3879_s10 = smov 32  }
 0x2bd   :  { %v4148_v59 = vpack.c.bf16 %v63_v56, %v62_v55 }
 0x2be   :  { %v339_v0 = vrot.slane %v338_v61, 2  ;;  %v333_v1 = vrot.slane %v332_v62, 2  ;;  %v4055_v15 = vadd.f32 %v3160_v7, %v256_v5 }
 0x2bf   :  { %v242_v2 = vpop.permute.xlu1 %241  ;;  %3591 = vmatpush3.bf16.msra.mxu1 %v4148_v59 }
 0x2c0   :  { %v340_v3 = vadd.f32 %v339_v0, %v338_v61  ;;  %v334_v4 = vadd.f32 %v333_v1, %v332_v62  ;;  %v255_v6 = vmul.f32 %v3159_v63, %v242_v2  ;;  %3592 = vmatprep.subr.bf16.mxu1 %v3874_v53 }
 0x2c2   :  { %v341_v8 = vrot.slane %v340_v3, 1  ;;  %v335_v9 = vrot.slane %v334_v4, 1  ;;  %v4057_v16 = vadd.f32 %v3160_v7, %v255_v6 }
 0x2c4   :  { %v342_v11 = vadd.f32 %v341_v8, %v340_v3  ;;  %v336_v14 = vadd.f32 %v335_v9, %v334_v4  ;;  %v3880_v4 = vmov 1966171168  }
 0x2c5   :  { %v549_v5 = vunpack.c.l.s4 %v3880_v4 }
 0x2c6   :  { %v344_v17 = vadd.f32 %v342_v11, %v4055_v15  ;;  %v343_v18 = vadd.f32 %v336_v14, %v4057_v16 }
 0x2c7   :  { %v550_v6 = vunpack.c.0.s8 %v549_v5 }
 0x2c8   :  { %3734 = vtanh.f32 %v344_v17 }
 0x2c9   :  { %3736 = vtanh.f32 %v343_v18  ;;  %v4174_v7 = vsub.s32 %v550_v6, %v4018_v32 }
 0x2d2   :  { %v3735_v27 = vpop.eup %3734 }
 0x2d3   :  { %v3737_v29 = vpop.eup %3736  ;;  %v354_v30 = vmul.f32 %v3735_v27, %v4083_v25 }
 0x2d4   :  { %v353_v34 = vmul.f32 %v3737_v29, %v4083_v25 }
 0x2d5   :  { %v362_v31 = vadd.f32 %v4093_v28, %v354_v30 }
 0x2d6   :  { %v361_v35 = vadd.f32 %v4093_v28, %v353_v34 }
 0x2d7   :  { %367 = vrot.lane.b32.xlu1 %v362_v31, %s3877_s29 }
 0x2db   :  { %365 = vrot.lane.b32.xlu1 %v361_v35, %s3877_s29 }
 0x349   :  { %v368_v36 = vpop.permute.xlu1 %367 }
 0x34a   :  { %v4101_v37 = vmul.f32 %v368_v36, %v362_v31 }
 0x34c   :  { %3738 = vtanh.f32 %v4101_v37  ;;  %v395_v39 = vrot.slane %v4101_v37, 7 }
 0x34d   :  { %v366_v38 = vpop.permute.xlu1 %365 }
 0x34e   :  { %v4105_v40 = vmul.f32 %v366_v38, %v361_v35 }
 0x350   :  { %3740 = vtanh.f32 %v4105_v40  ;;  %v396_v43 = vsel %vm298_vm1, %v395_v39, %v4105_v40 }
 0x351   :  { %3336 = vmatmul.mubr.msk.f32.vlgmr.msra.gmra.mrb[2].mxu0 %vm77_vm0, %v396_v43 }
 0x352   :  { %3346 = vmatprep.mubr.msk.f32.mxu0 %vm3875_vm3, %v3876_v26  ;;  %3582 = vmatpush3.bf16.msra.mxu0 %v4124_v49 }
 0x353   :  { %3583 = vmatprep.subr.bf16.mxu0 %v3874_v53 }
 0x356   :  { %v3739_v58 = vpop.eup %3738  ;;  %3585 = vmatpush3.bf16.msra.mxu0 %v4144_v57 }
 0x357   :  { %379 = vrot.lane.b32.xlu1 %v3739_v58, %s3878_s2  ;;  %3604 = vmatprep.subr.bf16.mxu0 %v3874_v53 }
 0x35a   :  { %v3741_v60 = vpop.eup %3740 }
 0x35b   :  { %377 = vrot.lane.b32.xlu1 %v3741_v60, %s3878_s2 }
 0x3c9   :  { %v380_v61 = vpop.permute.xlu1 %379 }
 0x3ca   :  { %v384_v62 = vmul.f32 %v380_v61, %v362_v31 }
 0x3cc   :  { %v471_v0 = vrot.slane %v384_v62, 7 }
 0x3cd   :  { %v378_v63 = vpop.permute.xlu1 %377 }
 0x3ce   :  { %v383_v1 = vmul.f32 %v378_v63, %v361_v35 }
 0x3d0   :  { %v472_v2 = vsel %vm298_vm1, %v471_v0, %v383_v1  ;;  %v733_v1 = vrot.slane %v4105_v40, 7 }
 0x3d1   :  { %473 = vrot.lane.b32.xlu1 %v472_v2, %s3879_s10 }
 0x443   :  { %v474_v3 = vpop.permute.xlu1 %473 }
 0x444   :  { %3347 = vmatmul.mubr.msk.f32.vlgmr.msra.gmra.mrb[2].mxu0 %vm77_vm0, %v474_v3  ;;  %3358 = vmatmul.mubr.msk.f32.vlgmr.msra.gmra.mrb[2].mxu1 %vm77_vm0, %v474_v3 }
 0x445   :  { %3594 = vmatpush3.bf16.msra.mxu1 %v4067_v21  ;;  %3368 = vmatprep.mubr.msk.f32.mxu1 %vm3875_vm3, %v3876_v26 }
 0x446   :  { %3595 = vmatprep.subr.bf16.mxu1 %v3874_v53  ;;  %3606 = vmatpush3.bf16.msra.mxu0 %v4135_v54 }
 0x447   :  { %3607 = vmatprep.subr.bf16.mxu0 %v3874_v53  ;;  %3390 = vmatprep.mubr.msk.f32.mxu0 %vm3875_vm3, %v3876_v26 }
 0x449   :  { %3597 = vmatpush3.bf16.msra.mxu1 %v4077_v24 }
 0x44a   :  { %3598 = vmatprep.subr.bf16.mxu1 %v3874_v53  ;;  %3609 = vmatpush3.bf16.msra.mxu0 %v4148_v59 }
 0x44b   :  { %3610 = vmatprep.subr.bf16.mxu0 %v3874_v53 }
 0x517   :  { %v543_v8 = vpop.f32.mrb[2].mxu0  ;;  %v4176_v9 = vpop.f32.mrb[2].mxu1 }
 0x518   :  { %v554_v11 = vrot.slane %v543_v8, %v4174_v7  ;;  %v3348_v14 = vpop.f32.mrb[3].mxu0  ;;  %v3359_v17 = vpop.f32.mrb[3].mxu1 }
 0x51a   :  { %v555_v18 = vcombine.high %v554_v11, %v554_v11  ;;  %v562_v19 = vrot.slane %v554_v11, %v4174_v7 }
 0x51c   :  { %v569_v20 = vrot.slane %v555_v18, %v4174_v7  ;;  %v573_v22 = vrot.slane %v562_v19, %v4032_v44 }
 0x51e   :  { %v577_v23 = vrot.slane %v569_v20, %v4032_v44  ;;  %v580_v27 = vadd.f32 %v573_v22, %v3992_v12 }
 0x520   :  { %v581_v32 = vadd.f32 %v577_v23, %v3990_v10  ;;  %3742 = vtanh.f32 %v580_v27 }
 0x522   :  { %3744 = vtanh.f32 %v581_v32  ;;  %v722_v32 = vrot.slane %v4176_v9, 7 }
 0x52a   :  { %v3743_v29 = vpop.eup %3742 }
 0x52b   :  { %v584_v30 = vmul.f32 %v3743_v29, %v3999_v13 }
 0x52c   :  { %v3745_v31 = vpop.eup %3744 }
 0x52d   :  { %v586_v34 = vsel %vm77_vm0, %v584_v30, 0.0  ;;  %v585_v35 = vmul.f32 %v3745_v31, %v3999_v13 }
 0x52e   :  { %587 = vadd.xlane.f32.xlu1 %v586_v34 }
 0x52f   :  { %v589_v36 = vsel %vm77_vm0, %v585_v35, 0.0 }
 0x530   :  { %590 = vadd.xlane.f32.xlu0 %v589_v36 }
 0x5bb   :  { %v588_v38 = vpop.xlane.xlu1 %587 }
 0x5bc   :  { %v592_v43 = vmul.f32 1.442695, %v588_v38 }
 0x5bd   :  { %v591_v46 = vpop.xlane.xlu0 %590 }
 0x5be   :  { %3746 = vpow2.f32 %v592_v43  ;;  %v594_v47 = vmul.f32 1.442695, %v591_v46 }
 0x5c0   :  { %3748 = vpow2.f32 %v594_v47 }
 0x5c8   :  { %v3747_v48 = vpop.eup %3746 }
 0x5c9   :  { %v601_v51 = vrot.slane %v3747_v48, %v4021_v33 }
 0x5ca   :  { %v3749_v50 = vpop.eup %3748 }
 0x5cb   :  { %v605_v52 = vrot.slane %v3749_v50, %v4021_v33 }
 0x5cd   :  { %v606_v55 = vsel %vm298_vm1, %v605_v52, %v601_v51 }
 0x5ce   :  { %v608_v56 = vsel %vm301_vm2, %v606_v55, 0.0 }
 0x5cf   :  { %609 = vadd.xlane.f32.xlu0 %v608_v56 }
 0x65c   :  { %v610_v58 = vpop.xlane.xlu0 %609 }
 0x65d   :  { %3750 = vrcp.f32 %v610_v58 }
 0x667   :  { %v3751_v60 = vpop.eup %3750 }
 0x668   :  { %v620_v61 = vrot.slane %v3751_v60, %v4035_v45  ;;  %v616_v62 = vrot.slane %v3751_v60, %v4032_v44 }
 0x66a   :  { %v624_v63 = vmul.f32 %v3749_v50, %v620_v61  ;;  %v623_v0 = vmul.f32 %v3747_v48, %v616_v62 }
 0x66c   :  { %632 = vperm.xlu0 %3723, %v624_v63   ;;  %627 = vperm.xlu1 %3722, %v623_v0  }
 0x670   :  { %734 = vrot.lane.b32.xlu0 %v733_v1, %s3879_s10 }
 0x6eb   :  { %v633_v2 = vpop.permute.xlu0 %632  ;;  %v628_v3 = vpop.permute.xlu1 %627 }
 0x6ec   :  { %v636_v4 = vmul.f32 %v4027_v41, %v633_v2  ;;  %v635_v5 = vmul.f32 %v628_v3, %v4029_v42 }
 0x6ee   :  { %v643_v6 = vrot.slane %v636_v4, 4  ;;  %v637_v8 = vrot.slane %v635_v5, 4 }
 0x6ef   :  { %v735_v52 = vpop.permute.xlu0 %734 }
 0x6f0   :  { %v644_v11 = vadd.f32 %v643_v6, %v636_v4  ;;  %v638_v14 = vadd.f32 %v637_v8, %v635_v5 }
 0x6f2   :  { %v645_v17 = vrot.slane %v644_v11, 2  ;;  %v639_v18 = vrot.slane %v638_v14, 2 }
 0x6f4   :  { %v646_v19 = vadd.f32 %v645_v17, %v644_v11  ;;  %v640_v20 = vadd.f32 %v639_v18, %v638_v14 }
 0x6f6   :  { %v647_v22 = vrot.slane %v646_v19, 1  ;;  %v641_v23 = vrot.slane %v640_v20, 1 }
 0x6f8   :  { %v648_v27 = vadd.f32 %v647_v22, %v646_v19  ;;  %v642_v40 = vadd.f32 %v641_v23, %v640_v20 }
 0x6fa   :  { %v650_v29 = vadd.f32 %v648_v27, %v4055_v15  ;;  %v649_v30 = vadd.f32 %v642_v40, %v4057_v16 }
 0x6fc   :  { %v726_v31 = vadd.f32 %v4176_v9, %v650_v29  ;;  %v725_v34 = vadd.f32 %v722_v32, %v649_v30 }
 0x6fe   :  { %3752 = vtanh.f32 %v726_v31 }
 0x6ff   :  { %3754 = vtanh.f32 %v725_v34 }
 0x708   :  { %v3753_v35 = vpop.eup %3752 }
 0x709   :  { %v3755_v36 = vpop.eup %3754  ;;  %v730_v46 = vmul.f32 %v3753_v35, %v4083_v25 }
 0x70a   :  { %v729_v38 = vmul.f32 %v3755_v36, %v4083_v25 }
 0x70b   :  { %v732_v47 = vadd.f32 %v4093_v28, %v730_v46 }
 0x70c   :  { %v731_v43 = vadd.f32 %v4093_v28, %v729_v38 }
 0x70e   :  { %744 = vrot.lane.b32.xlu1 %v731_v43, %s3877_s29  ;;  %v740_v55 = vmul.f32 %v735_v52, %v731_v43 }
 0x712   :  { %746 = vrot.lane.b32.xlu1 %v732_v47, %s3877_s29 }
 0x716   :  { %736 = vrot.lane.b32.xlu1 %v395_v39, %s3879_s10 }
 0x780   :  { %v745_v9 = vpop.permute.xlu1 %744 }
 0x781   :  { %v750_v48 = vmul.f32 %v745_v9, %v731_v43 }
 0x783   :  { %754 = vrot.lane.b32.xlu0 %v750_v48, %s3879_s10 }
 0x784   :  { %v747_v50 = vpop.permute.xlu1 %746 }
 0x785   :  { %v751_v51 = vmul.f32 %v747_v50, %v732_v47 }
 0x787   :  { %756 = vrot.lane.b32.xlu1 %v751_v51, %s3879_s10 }
 0x788   :  { %v737_v56 = vpop.permute.xlu1 %736 }
 0x789   :  { %v741_v61 = vmul.f32 %v737_v56, %v732_v47 }
 0x7f5   :  { %v755_v58 = vpop.permute.xlu0 %754 }
 0x7f6   :  { %v4214_v60 = vadd.f32 %v755_v58, %v740_v55 }
 0x7f8   :  { %3756 = vtanh.f32 %v4214_v60  ;;  %v776_v63 = vrot.slane %v4214_v60, 1 }
 0x7f9   :  { %v757_v62 = vpop.permute.xlu1 %756 }
 0x7fa   :  { %v4217_v37 = vadd.f32 %v757_v62, %v741_v61 }
 0x7fc   :  { %3758 = vtanh.f32 %v4217_v37  ;;  %v777_v1 = vsel %vm298_vm1, %v4217_v37, %v776_v63 }
 0x802   :  { %v3757_v39 = vpop.eup %3756 }
 0x803   :  { %766 = vrot.lane.b32.xlu0 %v3757_v39, %s3877_s29 }
 0x806   :  { %v3759_v0 = vpop.eup %3758 }
 0x807   :  { %768 = vrot.lane.b32.xlu1 %v3759_v0, %s3877_s29  ;;  %778 = vrot.lane.b32.xlu0 %v777_v1, %s3878_s2 }
 0x875   :  { %v767_v2 = vpop.permute.xlu0 %766 }
 0x876   :  { %v772_v3 = vmul.f32 %v767_v2, %v731_v43 }
 0x878   :  { %v854_v6 = vrot.slane %v772_v3, 1 }
 0x879   :  { %v769_v4 = vpop.permute.xlu1 %768  ;;  %v779_v5 = vpop.permute.xlu0 %778 }
 0x87a   :  { %v773_v8 = vmul.f32 %v769_v4, %v732_v47  ;;  %3369 = vmatmul.mubr.msk.f32.vlgmr.msra.gmra.mrb[4].mxu1 %vm77_vm0, %v779_v5 }
 0x87b   :  { %3600 = vmatpush3.bf16.msra.mxu1 %v4124_v49  ;;  %3379 = vmatprep.mubr.msk.f32.mxu1 %vm3875_vm3, %v3876_v26 }
 0x87c   :  { %v855_v11 = vsel %vm298_vm1, %v773_v8, %v854_v6  ;;  %3601 = vmatprep.subr.bf16.mxu1 %v3874_v53 }
 0x87d   :  { %856 = vrot.lane.b32.xlu1 %v855_v11, %s3879_s10 }
 0x87f   :  { %3603 = vmatpush3.bf16.msra.mxu1 %v4144_v57 }
 0x880   :  { %3622 = vmatprep.subr.bf16.mxu1 %v3874_v53 }
 0x8ef   :  { %v857_v14 = vpop.permute.xlu1 %856 }
 0x8f0   :  { %3380 = vmatmul.mubr.msk.f32.vlgmr.msra.gmra.mrb[4].mxu1 %vm77_vm0, %v857_v14  ;;  %3391 = vmatmul.mubr.msk.f32.vlgmr.msra.gmra.mrb[4].mxu0 %vm77_vm0, %v857_v14 }
 0x8f1   :  { %3612 = vmatpush3.bf16.msra.mxu0 %v4067_v21  ;;  %3401 = vmatprep.mubr.msk.f32.mxu0 %vm3875_vm3, %v3876_v26 }
 0x8f2   :  { %3613 = vmatprep.subr.bf16.mxu0 %v3874_v53  ;;  %3624 = vmatpush3.bf16.msra.mxu1 %v4135_v54 }
 0x8f3   :  { %3625 = vmatprep.subr.bf16.mxu1 %v3874_v53  ;;  %3423 = vmatprep.mubr.msk.f32.mxu1 %vm3875_vm3, %v3876_v26 }
 0x8f5   :  { %3615 = vmatpush3.bf16.msra.mxu0 %v4077_v24 }
 0x8f6   :  { %3616 = vmatprep.subr.bf16.mxu0 %v3874_v53  ;;  %3627 = vmatpush3.bf16.msra.mxu1 %v4148_v59 }
 0x8f7   :  { %3628 = vmatprep.subr.bf16.mxu1 %v3874_v53 }
 0x9c3   :  { %v926_v17 = vpop.f32.mrb[4].mxu1  ;;  %v4249_v18 = vpop.f32.mrb[4].mxu0 }
 0x9c4   :  { %v937_v19 = vrot.slane %v926_v17, %v4174_v7  ;;  %v3381_v20 = vpop.f32.mrb[5].mxu1  ;;  %v3392_v22 = vpop.f32.mrb[5].mxu0 }
 0x9c6   :  { %v938_v23 = vcombine.high %v937_v19, %v937_v19  ;;  %v945_v27 = vrot.slane %v937_v19, %v4174_v7 }
 0x9c8   :  { %v952_v40 = vrot.slane %v938_v23, %v4174_v7  ;;  %v956_v32 = vrot.slane %v945_v27, %v4032_v44 }
 0x9ca   :  { %v960_v29 = vrot.slane %v952_v40, %v4032_v44  ;;  %v963_v30 = vadd.f32 %v956_v32, %v3992_v12 }
 0x9cc   :  { %v964_v31 = vadd.f32 %v960_v29, %v3990_v10  ;;  %3760 = vtanh.f32 %v963_v30  ;;  %v1105_v30 = vrot.slane %v4249_v18, 6 }
 0x9ce   :  { %3762 = vtanh.f32 %v964_v31  ;;  %v1106_v31 = vrot.slane %v4249_v18, 7 }
 0x9d6   :  { %v3761_v34 = vpop.eup %3760 }
 0x9d7   :  { %v967_v35 = vmul.f32 %v3761_v34, %v3999_v13 }
 0x9d8   :  { %v3763_v36 = vpop.eup %3762 }
 0x9d9   :  { %v969_v38 = vsel %vm77_vm0, %v967_v35, 0.0  ;;  %v968_v43 = vmul.f32 %v3763_v36, %v3999_v13 }
 0x9da   :  { %970 = vadd.xlane.f32.xlu0 %v969_v38 }
 0x9db   :  { %v972_v46 = vsel %vm77_vm0, %v968_v43, 0.0 }
 0x9dc   :  { %973 = vadd.xlane.f32.xlu1 %v972_v46 }
 0xa67   :  { %v971_v47 = vpop.xlane.xlu0 %970 }
 0xa68   :  { %v975_v9 = vmul.f32 1.442695, %v971_v47 }
 0xa69   :  { %v974_v48 = vpop.xlane.xlu1 %973 }
 0xa6a   :  { %3764 = vpow2.f32 %v975_v9  ;;  %v977_v50 = vmul.f32 1.442695, %v974_v48 }
 0xa6c   :  { %3766 = vpow2.f32 %v977_v50 }
 0xa74   :  { %v3765_v51 = vpop.eup %3764 }
 0xa75   :  { %v984_v55 = vrot.slane %v3765_v51, %v4021_v33 }
 0xa76   :  { %v3767_v52 = vpop.eup %3766 }
 0xa77   :  { %v988_v56 = vrot.slane %v3767_v52, %v4021_v33 }
 0xa79   :  { %v989_v58 = vsel %vm298_vm1, %v988_v56, %v984_v55  ;;  %v1118_v56 = vrot.slane %v4217_v37, 7 }
 0xa7a   :  { %v991_v61 = vsel %vm301_vm2, %v989_v58, 0.0  ;;  %v1117_v58 = vrot.slane %v4214_v60, 7 }
 0xa7b   :  { %992 = vadd.xlane.f32.xlu0 %v991_v61 }
 0xb08   :  { %v993_v62 = vpop.xlane.xlu0 %992 }
 0xb09   :  { %3768 = vrcp.f32 %v993_v62 }
 0xb13   :  { %v3769_v39 = vpop.eup %3768 }
 0xb14   :  { %v1003_v63 = vrot.slane %v3769_v39, %v4035_v45  ;;  %v999_v0 = vrot.slane %v3769_v39, %v4032_v44 }
 0xb16   :  { %v1007_v1 = vmul.f32 %v3767_v52, %v1003_v63  ;;  %v1006_v2 = vmul.f32 %v3765_v51, %v999_v0 }
 0xb18   :  { %1015 = vperm.xlu1 %3722, %v1007_v1   ;;  %1010 = vperm.xlu0 %3723, %v1006_v2  }
 0xb97   :  { %v1016_v3 = vpop.permute.xlu1 %1015  ;;  %v1011_v4 = vpop.permute.xlu0 %1010 }
 0xb98   :  { %v1019_v5 = vmul.f32 %v4027_v41, %v1016_v3  ;;  %v1018_v6 = vmul.f32 %v1011_v4, %v4029_v42 }
 0xb9a   :  { %v1026_v8 = vrot.slane %v1019_v5, 4  ;;  %v1020_v11 = vrot.slane %v1018_v6, 4 }
 0xb9c   :  { %v1027_v14 = vadd.f32 %v1026_v8, %v1019_v5  ;;  %v1021_v17 = vadd.f32 %v1020_v11, %v1018_v6 }
 0xb9e   :  { %v1028_v19 = vrot.slane %v1027_v14, 2  ;;  %v1022_v20 = vrot.slane %v1021_v17, 2 }
 0xba0   :  { %v1029_v22 = vadd.f32 %v1028_v19, %v1027_v14  ;;  %v1023_v23 = vadd.f32 %v1022_v20, %v1021_v17 }
 0xba2   :  { %v1030_v27 = vrot.slane %v1029_v22, 1  ;;  %v1024_v40 = vrot.slane %v1023_v23, 1 }
 0xba4   :  { %v1031_v32 = vadd.f32 %v1030_v27, %v1029_v22  ;;  %v1025_v29 = vadd.f32 %v1024_v40, %v1023_v23 }
 0xba6   :  { %v1033_v34 = vadd.f32 %v1031_v32, %v4055_v15  ;;  %v1032_v35 = vadd.f32 %v1025_v29, %v4057_v16 }
 0xba8   :  { %v1110_v36 = vadd.f32 %v1106_v31, %v1033_v34  ;;  %v1109_v38 = vadd.f32 %v1105_v30, %v1032_v35 }
 0xbaa   :  { %3770 = vtanh.f32 %v1110_v36 }
 0xbab   :  { %3772 = vtanh.f32 %v1109_v38 }
 0xbb4   :  { %v3771_v43 = vpop.eup %3770 }
 0xbb5   :  { %v3773_v46 = vpop.eup %3772  ;;  %v1114_v47 = vmul.f32 %v3771_v43, %v4083_v25 }
 0xbb6   :  { %v1113_v9 = vmul.f32 %v3773_v46, %v4083_v25 }
 0xbb7   :  { %v1116_v48 = vadd.f32 %v4093_v28, %v1114_v47 }
 0xbb8   :  { %v1115_v50 = vadd.f32 %v4093_v28, %v1113_v9 }
 0xbb9   :  { %1127 = vrot.lane.b32.xlu0 %v1116_v48, %s3877_s29  ;;  %v1122_v61 = vmul.f32 %v1118_v56, %v1116_v48 }
 0xbba   :  { %1125 = vrot.lane.b32.xlu1 %v1115_v50, %s3877_s29  ;;  %v1121_v39 = vmul.f32 %v1117_v58, %v1115_v50 }
 0xc2b   :  { %v1128_v18 = vpop.permute.xlu0 %1127 }
 0xc2c   :  { %v1132_v51 = vmul.f32 %v1128_v18, %v1116_v48  ;;  %v1126_v52 = vpop.permute.xlu1 %1125 }
 0xc2d   :  { %v1131_v55 = vmul.f32 %v1126_v52, %v1115_v50 }
 0xc2e   :  { %1137 = vrot.lane.b32.xlu0 %v1132_v51, %s3879_s10 }
 0xc2f   :  { %1135 = vrot.lane.b32.xlu1 %v1131_v55, %s3879_s10 }
 0xca0   :  { %v1138_v62 = vpop.permute.xlu0 %1137 }
 0xca1   :  { %v4284_v63 = vadd.f32 %v1138_v62, %v1122_v61  ;;  %v1136_v0 = vpop.permute.xlu1 %1135 }
 0xca2   :  { %v4286_v1 = vadd.f32 %v1136_v0, %v1121_v39 }
 0xca3   :  { %3774 = vtanh.f32 %v4284_v63  ;;  %v1158_v2 = vrot.slane %v4284_v63, 1 }
 0xca4   :  { %3776 = vtanh.f32 %v4286_v1  ;;  %v1157_v3 = vrot.slane %v4286_v1, 2 }
 0xca6   :  { %v1159_v37 = vsel %vm298_vm1, %v1158_v2, %v1157_v3 }
 0xcad   :  { %v3775_v4 = vpop.eup %3774 }
 0xcae   :  { %v3777_v60 = vpop.eup %3776  ;;  %1149 = vrot.lane.b32.xlu0 %v3775_v4, %s3877_s29 }
 0xcaf   :  { %1147 = vrot.lane.b32.xlu1 %v3777_v60, %s3877_s29 }
 0xcb3   :  { %1160 = vrot.lane.b32.xlu1 %v1159_v37, %s3878_s2 }
 0xd20   :  { %v1150_v5 = vpop.permute.xlu0 %1149 }
 0xd21   :  { %v1154_v6 = vmul.f32 %v1150_v5, %v1116_v48  ;;  %v1148_v8 = vpop.permute.xlu1 %1147 }
 0xd22   :  { %v1153_v11 = vmul.f32 %v1148_v8, %v1115_v50 }
 0xd23   :  { %v1237_v14 = vrot.slane %v1154_v6, 1 }
 0xd24   :  { %v1236_v17 = vrot.slane %v1153_v11, 2 }
 0xd25   :  { %v1161_v19 = vpop.permute.xlu1 %1160 }
 0xd26   :  { %3402 = vmatmul.mubr.msk.f32.vlgmr.msra.gmra.mrb[6].mxu0 %vm77_vm0, %v1161_v19  ;;  %v1238_v20 = vsel %vm298_vm1, %v1237_v14, %v1236_v17 }
 0xd27   :  { %1239 = vrot.lane.b32.xlu0 %v1238_v20, %s3879_s10  ;;  %3618 = vmatpush3.bf16.msra.mxu0 %v4124_v49 }
 0xd28   :  { %3619 = vmatprep.subr.bf16.mxu0 %v3874_v53  ;;  %3412 = vmatprep.mubr.msk.f32.mxu0 %vm3875_vm3, %v3876_v26 }
 0xd2b   :  { %3621 = vmatpush3.bf16.msra.mxu0 %v4144_v57 }
 0xd2c   :  { %3640 = vmatprep.subr.bf16.mxu0 %v3874_v53 }
 0xd99   :  { %v1240_v22 = vpop.permute.xlu0 %1239 }
 0xd9a   :  { %3413 = vmatmul.mubr.msk.f32.vlgmr.msra.gmra.mrb[6].mxu0 %vm77_vm0, %v1240_v22  ;;  %3424 = vmatmul.mubr.msk.f32.vlgmr.msra.gmra.mrb[6].mxu1 %vm77_vm0, %v1240_v22 }
 0xd9b   :  { %3630 = vmatpush3.bf16.msra.mxu1 %v4067_v21  ;;  %3434 = vmatprep.mubr.msk.f32.mxu1 %vm3875_vm3, %v3876_v26 }
 0xd9c   :  { %3631 = vmatprep.subr.bf16.mxu1 %v3874_v53  ;;  %3642 = vmatpush3.bf16.msra.mxu0 %v4135_v54 }
 0xd9d   :  { %3643 = vmatprep.subr.bf16.mxu0 %v3874_v53  ;;  %3456 = vmatprep.mubr.msk.f32.mxu0 %vm3875_vm3, %v3876_v26 }
 0xd9f   :  { %3633 = vmatpush3.bf16.msra.mxu1 %v4077_v24 }
 0xda0   :  { %3634 = vmatprep.subr.bf16.mxu1 %v3874_v53  ;;  %3645 = vmatpush3.bf16.msra.mxu0 %v4148_v59 }
 0xda1   :  { %3646 = vmatprep.subr.bf16.mxu0 %v3874_v53 }
 0xe6d   :  { %v1309_v23 = vpop.f32.mrb[6].mxu0  ;;  %v4319_v27 = vpop.f32.mrb[6].mxu1 }
 0xe6e   :  { %v1320_v40 = vrot.slane %v1309_v23, %v4174_v7  ;;  %v3414_v32 = vpop.f32.mrb[7].mxu0  ;;  %v3425_v29 = vpop.f32.mrb[7].mxu1 }
 0xe70   :  { %v1321_v30 = vcombine.high %v1320_v40, %v1320_v40  ;;  %v1328_v31 = vrot.slane %v1320_v40, %v4174_v7 }
 0xe72   :  { %v1335_v34 = vrot.slane %v1321_v30, %v4174_v7  ;;  %v1339_v35 = vrot.slane %v1328_v31, %v4032_v44 }
 0xe74   :  { %v1343_v36 = vrot.slane %v1335_v34, %v4032_v44  ;;  %v1346_v38 = vadd.f32 %v1339_v35, %v3992_v12 }
 0xe76   :  { %v1347_v43 = vadd.f32 %v1343_v36, %v3990_v10  ;;  %3778 = vtanh.f32 %v1346_v38  ;;  %v1488_v36 = vrot.slane %v4319_v27, 5  ;;  %v1489_v38 = vrot.slane %v4319_v27, 6 }
 0xe78   :  { %3780 = vtanh.f32 %v1347_v43 }
 0xe80   :  { %v3779_v46 = vpop.eup %3778 }
 0xe81   :  { %v1350_v47 = vmul.f32 %v3779_v46, %v3999_v13 }
 0xe82   :  { %v3781_v9 = vpop.eup %3780 }
 0xe83   :  { %v1352_v48 = vsel %vm77_vm0, %v1350_v47, 0.0  ;;  %v1351_v50 = vmul.f32 %v3781_v9, %v3999_v13 }
 0xe84   :  { %1353 = vadd.xlane.f32.xlu1 %v1352_v48 }
 0xe85   :  { %v1355_v18 = vsel %vm77_vm0, %v1351_v50, 0.0 }
 0xe86   :  { %1356 = vadd.xlane.f32.xlu0 %v1355_v18 }
 0xf11   :  { %v1354_v51 = vpop.xlane.xlu1 %1353 }
 0xf12   :  { %v1358_v52 = vmul.f32 1.442695, %v1354_v51 }
 0xf13   :  { %v1357_v55 = vpop.xlane.xlu0 %1356 }
 0xf14   :  { %3782 = vpow2.f32 %v1358_v52  ;;  %v1360_v56 = vmul.f32 1.442695, %v1357_v55 }
 0xf16   :  { %3784 = vpow2.f32 %v1360_v56 }
 0xf1e   :  { %v3783_v58 = vpop.eup %3782 }
 0xf1f   :  { %v1367_v62 = vrot.slane %v3783_v58, %v4021_v33 }
 0xf20   :  { %v3785_v61 = vpop.eup %3784 }
 0xf21   :  { %v1371_v39 = vrot.slane %v3785_v61, %v4021_v33 }
 0xf23   :  { %v1372_v0 = vsel %vm298_vm1, %v1371_v39, %v1367_v62  ;;  %v1500_v62 = vrot.slane %v4286_v1, 7 }
 0xf24   :  { %v1374_v13 = vsel %vm301_vm2, %v1372_v0, 0.0 }
 0xf25   :  { %1375 = vadd.xlane.f32.xlu0 %v1374_v13 }
 0xfb2   :  { %v1376_v2 = vpop.xlane.xlu0 %1375 }
 0xfb3   :  { %3786 = vrcp.f32 %v1376_v2 }
 0xfbd   :  { %v3787_v3 = vpop.eup %3786 }
 0xfbe   :  { %v1386_v37 = vrot.slane %v3787_v3, %v4035_v45  ;;  %v1382_v4 = vrot.slane %v3787_v3, %v4032_v44 }
 0xfc0   :  { %v1390_v60 = vmul.f32 %v3785_v61, %v1386_v37  ;;  %v1389_v5 = vmul.f32 %v3783_v58, %v1382_v4 }
 0xfc2   :  { %1398 = vperm.xlu0 %3723, %v1390_v60   ;;  %1393 = vperm.xlu1 %3722, %v1389_v5  }
0x1041   :  { %v1399_v6 = vpop.permute.xlu0 %1398  ;;  %v1394_v8 = vpop.permute.xlu1 %1393 }
0x1042   :  { %v1402_v11 = vmul.f32 %v4027_v41, %v1399_v6  ;;  %v1401_v14 = vmul.f32 %v1394_v8, %v4029_v42 }
0x1044   :  { %v1409_v17 = vrot.slane %v1402_v11, 4  ;;  %v1403_v19 = vrot.slane %v1401_v14, 4 }
0x1046   :  { %v1410_v20 = vadd.f32 %v1409_v17, %v1402_v11  ;;  %v1404_v22 = vadd.f32 %v1403_v19, %v1401_v14 }
0x1048   :  { %v1411_v23 = vrot.slane %v1410_v20, 2  ;;  %v1405_v40 = vrot.slane %v1404_v22, 2 }
0x104a   :  { %v1412_v32 = vadd.f32 %v1411_v23, %v1410_v20  ;;  %v1406_v29 = vadd.f32 %v1405_v40, %v1404_v22 }
0x104c   :  { %v1413_v30 = vrot.slane %v1412_v32, 1  ;;  %v1407_v31 = vrot.slane %v1406_v29, 1 }
0x104e   :  { %v1414_v34 = vadd.f32 %v1413_v30, %v1412_v32  ;;  %v1408_v35 = vadd.f32 %v1407_v31, %v1406_v29 }
0x1050   :  { %v1416_v43 = vadd.f32 %v1414_v34, %v4055_v15  ;;  %v1415_v46 = vadd.f32 %v1408_v35, %v4057_v16 }
0x1052   :  { %v1493_v47 = vadd.f32 %v1489_v38, %v1416_v43  ;;  %v1492_v9 = vadd.f32 %v1488_v36, %v1415_v46 }
0x1054   :  { %3788 = vtanh.f32 %v1493_v47 }
0x1055   :  { %3790 = vtanh.f32 %v1492_v9  ;;  %v4401_v9 = vld [vmem:[%s4671_s6] ss:$0 sm:$0xff] }
0x105e   :  { %v3789_v48 = vpop.eup %3788 }
0x105f   :  { %v3791_v50 = vpop.eup %3790  ;;  %v1497_v52 = vmul.f32 %v3789_v48, %v4083_v25 }
0x1060   :  { %v1496_v18 = vmul.f32 %v3791_v50, %v4083_v25  ;;  %v1501_v25 = vrot.slane %v4284_v63, 7 }
0x1061   :  { %v1499_v27 = vadd.f32 %v4093_v28, %v1497_v52 }
0x1062   :  { %v1498_v51 = vadd.f32 %v4093_v28, %v1496_v18 }
0x1063   :  { %v1505_v28 = vmul.f32 %v1501_v25, %v1499_v27 }
0x1064   :  { %1508 = vrot.lane.b32.xlu1 %v1498_v51, %s3877_s29  ;;  %v1504_v39 = vmul.f32 %v1500_v62, %v1498_v51 }
0x1068   :  { %1510 = vrot.lane.b32.xlu1 %v1499_v27, %s3877_s29 }
0x10d6   :  { %v1509_v55 = vpop.permute.xlu1 %1508 }
0x10d7   :  { %v1514_v56 = vmul.f32 %v1509_v55, %v1498_v51 }
0x10d9   :  { %1518 = vrot.lane.b32.xlu0 %v1514_v56, %s3879_s10 }
0x10da   :  { %v1511_v58 = vpop.permute.xlu1 %1510 }
0x10db   :  { %v1515_v61 = vmul.f32 %v1511_v58, %v1499_v27 }
0x10dd   :  { %1520 = vrot.lane.b32.xlu1 %v1515_v61, %s3879_s10 }
0x114b   :  { %v1519_v0 = vpop.permute.xlu0 %1518 }
0x114c   :  { %v4353_v13 = vadd.f32 %v1519_v0, %v1504_v39 }
0x114e   :  { %3792 = vtanh.f32 %v4353_v13  ;;  %v1540_v37 = vrot.slane %v4353_v13, 3 }
0x114f   :  { %v1521_v2 = vpop.permute.xlu1 %1520 }
0x1150   :  { %v4357_v3 = vadd.f32 %v1521_v2, %v1505_v28 }
0x1152   :  { %3794 = vtanh.f32 %v4357_v3  ;;  %v1541_v4 = vrot.slane %v4357_v3, 2 }
0x1154   :  { %v1542_v1 = vsel %vm298_vm1, %v1541_v4, %v1540_v37 }
0x1158   :  { %v3793_v60 = vpop.eup %3792 }
0x1159   :  { %1530 = vrot.lane.b32.xlu0 %v3793_v60, %s3877_s29 }
0x115c   :  { %v3795_v5 = vpop.eup %3794 }
0x115d   :  { %1532 = vrot.lane.b32.xlu1 %v3795_v5, %s3877_s29  ;;  %1543 = vrot.lane.b32.xlu0 %v1542_v1, %s3878_s2 }
0x11cb   :  { %v1531_v63 = vpop.permute.xlu0 %1530 }
0x11cc   :  { %v1536_v6 = vmul.f32 %v1531_v63, %v1498_v51 }
0x11ce   :  { %v1619_v17 = vrot.slane %v1536_v6, 3 }
0x11cf   :  { %v1533_v8 = vpop.permute.xlu1 %1532  ;;  %v1544_v11 = vpop.permute.xlu0 %1543 }
0x11d0   :  { %v1537_v14 = vmul.f32 %v1533_v8, %v1499_v27  ;;  %3435 = vmatmul.mubr.msk.f32.vlgmr.msra.gmra.mrb[8].mxu1 %vm77_vm0, %v1544_v11 }
0x11d1   :  { %3636 = vmatpush3.bf16.msra.mxu1 %v4124_v49  ;;  %3445 = vmatprep.mubr.msk.f32.mxu1 %vm3875_vm3, %v3876_v26 }
0x11d2   :  { %v1620_v19 = vrot.slane %v1537_v14, 2  ;;  %3637 = vmatprep.subr.bf16.mxu1 %v3874_v53 }
0x11d4   :  { %v1621_v20 = vsel %vm298_vm1, %v1620_v19, %v1619_v17 }
0x11d5   :  { %1622 = vrot.lane.b32.xlu1 %v1621_v20, %s3879_s10  ;;  %3639 = vmatpush3.bf16.msra.mxu1 %v4144_v57 }
0x11d6   :  { %3658 = vmatprep.subr.bf16.mxu1 %v3874_v53 }
0x1247   :  { %v1623_v22 = vpop.permute.xlu1 %1622 }
0x1248   :  { %3446 = vmatmul.mubr.msk.f32.vlgmr.msra.gmra.mrb[8].mxu1 %vm77_vm0, %v1623_v22  ;;  %3457 = vmatmul.mubr.msk.f32.vlgmr.msra.gmra.mrb[8].mxu0 %vm77_vm0, %v1623_v22 }
0x1249   :  { %3648 = vmatpush3.bf16.msra.mxu0 %v4067_v21  ;;  %3467 = vmatprep.mubr.msk.f32.mxu0 %vm3875_vm3, %v3876_v26 }
0x124a   :  { %3649 = vmatprep.subr.bf16.mxu0 %v3874_v53  ;;  %3660 = vmatpush3.bf16.msra.mxu1 %v4135_v54 }
0x124b   :  { %3661 = vmatprep.subr.bf16.mxu1 %v3874_v53  ;;  %3489 = vmatprep.mubr.msk.f32.mxu1 %vm3875_vm3, %v3876_v26 }
0x124d   :  { %3651 = vmatpush3.bf16.msra.mxu0 %v4077_v24 }
0x124e   :  { %3652 = vmatprep.subr.bf16.mxu0 %v3874_v53  ;;  %3663 = vmatpush3.bf16.msra.mxu1 %v4148_v59 }
0x124f   :  { %3664 = vmatprep.subr.bf16.mxu1 %v3874_v53 }
0x131b   :  { %v1692_v23 = vpop.f32.mrb[8].mxu1  ;;  %v4389_v40 = vpop.f32.mrb[8].mxu0 }
0x131c   :  { %v1703_v32 = vrot.slane %v1692_v23, %v4174_v7  ;;  %v3447_v29 = vpop.f32.mrb[9].mxu1  ;;  %v3458_v30 = vpop.f32.mrb[9].mxu0 }
0x131e   :  { %v1704_v31 = vcombine.high %v1703_v32, %v1703_v32  ;;  %v1711_v34 = vrot.slane %v1703_v32, %v4174_v7 }
0x1320   :  { %v1718_v35 = vrot.slane %v1704_v31, %v4174_v7  ;;  %v1722_v36 = vrot.slane %v1711_v34, %v4032_v44 }
0x1322   :  { %v1726_v38 = vrot.slane %v1718_v35, %v4032_v44  ;;  %v1729_v43 = vadd.f32 %v1722_v36, %v3992_v12  ;;  %v1871_v36 = vrot.slane %v4389_v40, 4 }
0x1324   :  { %v1730_v46 = vadd.f32 %v1726_v38, %v3990_v10  ;;  %3796 = vtanh.f32 %v1729_v43  ;;  %v1872_v38 = vrot.slane %v4389_v40, 5  ;;  %v4429_v40 = vld [vmem:[%s4678_s12] ss:$0 sm:$0xff] }
0x1326   :  { %3798 = vtanh.f32 %v1730_v46 }
0x132e   :  { %v3797_v47 = vpop.eup %3796 }
0x132f   :  { %v1733_v48 = vmul.f32 %v4401_v9, %v3797_v47 }
0x1330   :  { %v3799_v50 = vpop.eup %3798 }
0x1331   :  { %v1735_v18 = vsel %vm77_vm0, %v1733_v48, 0.0  ;;  %v1734_v51 = vmul.f32 %v4401_v9, %v3799_v50 }
0x1332   :  { %1736 = vadd.xlane.f32.xlu0 %v1735_v18 }
0x1333   :  { %v1738_v52 = vsel %vm77_vm0, %v1734_v51, 0.0  ;;  %v4422_v51 = vld [vmem:[%s4677_s11] ss:$0 sm:$0xff] }
0x1334   :  { %1739 = vadd.xlane.f32.xlu1 %v1738_v52 }
0x13bf   :  { %v1737_v27 = vpop.xlane.xlu0 %1736 }
0x13c0   :  { %v1741_v55 = vmul.f32 1.442695, %v1737_v27 }
0x13c1   :  { %v1740_v56 = vpop.xlane.xlu1 %1739 }
0x13c2   :  { %3800 = vpow2.f32 %v1741_v55  ;;  %v1743_v58 = vmul.f32 1.442695, %v1740_v56 }
0x13c4   :  { %3802 = vpow2.f32 %v1743_v58 }
0x13cc   :  { %v3801_v61 = vpop.eup %3800 }
0x13cd   :  { %v1750_v39 = vrot.slane %v3801_v61, %v4021_v33 }
0x13ce   :  { %v3803_v62 = vpop.eup %3802 }
0x13cf   :  { %v1754_v0 = vrot.slane %v3803_v62, %v4021_v33 }
0x13d1   :  { %v1755_v25 = vsel %vm298_vm1, %v1754_v0, %v1750_v39  ;;  %v1884_v0 = vrot.slane %v4357_v3, 7 }
0x13d2   :  { %v1757_v28 = vsel %vm301_vm2, %v1755_v25, 0.0  ;;  %v1883_v25 = vrot.slane %v4353_v13, 7 }
0x13d3   :  { %1758 = vadd.xlane.f32.xlu0 %v1757_v28 }
0x1460   :  { %v1759_v2 = vpop.xlane.xlu0 %1758 }
0x1461   :  { %3804 = vrcp.f32 %v1759_v2 }
0x146b   :  { %v3805_v37 = vpop.eup %3804 }
0x146c   :  { %v1769_v4 = vrot.slane %v3805_v37, %v4035_v45  ;;  %v1765_v1 = vrot.slane %v3805_v37, %v4032_v44 }
0x146e   :  { %v1773_v60 = vmul.f32 %v3803_v62, %v1769_v4  ;;  %v1772_v5 = vmul.f32 %v3801_v61, %v1765_v1 }
0x1470   :  { %1781 = vperm.xlu1 %3722, %v1773_v60   ;;  %1776 = vperm.xlu0 %3723, %v1772_v5  }
0x14ef   :  { %v1782_v63 = vpop.permute.xlu1 %1781  ;;  %v1777_v6 = vpop.permute.xlu0 %1776 }
0x14f0   :  { %v1785_v8 = vmul.f32 %v4027_v41, %v1782_v63  ;;  %v1784_v11 = vmul.f32 %v1777_v6, %v4029_v42 }
0x14f2   :  { %v1792_v14 = vrot.slane %v1785_v8, 4  ;;  %v1786_v17 = vrot.slane %v1784_v11, 4 }
0x14f4   :  { %v1793_v19 = vadd.f32 %v1792_v14, %v1785_v8  ;;  %v1787_v20 = vadd.f32 %v1786_v17, %v1784_v11 }
0x14f6   :  { %v1794_v22 = vrot.slane %v1793_v19, 2  ;;  %v1788_v23 = vrot.slane %v1787_v20, 2 }
0x14f8   :  { %v1795_v32 = vadd.f32 %v1794_v22, %v1793_v19  ;;  %v1789_v29 = vadd.f32 %v1788_v23, %v1787_v20 }
0x14fa   :  { %v1796_v30 = vrot.slane %v1795_v32, 1  ;;  %v1790_v31 = vrot.slane %v1789_v29, 1 }
0x14fc   :  { %v1797_v34 = vadd.f32 %v1796_v30, %v1795_v32  ;;  %v1791_v35 = vadd.f32 %v1790_v31, %v1789_v29 }
0x14fe   :  { %v1799_v43 = vadd.f32 %v1797_v34, %v4055_v15  ;;  %v1798_v46 = vadd.f32 %v1791_v35, %v4057_v16 }
0x1500   :  { %v1876_v47 = vadd.f32 %v1872_v38, %v1799_v43  ;;  %v1875_v48 = vadd.f32 %v1871_v36, %v1798_v46 }
0x1502   :  { %3806 = vtanh.f32 %v1876_v47 }
0x1503   :  { %3808 = vtanh.f32 %v1875_v48 }
0x150c   :  { %v3807_v50 = vpop.eup %3806 }
0x150d   :  { %v3809_v18 = vpop.eup %3808  ;;  %v1880_v52 = vmul.f32 %v4422_v51, %v3807_v50 }
0x150e   :  { %v1879_v27 = vmul.f32 %v4422_v51, %v3809_v18 }
0x150f   :  { %v1882_v55 = vadd.f32 %v4429_v40, %v1880_v52 }
0x1510   :  { %v1881_v56 = vadd.f32 %v4429_v40, %v1879_v27 }
0x1511   :  { %1893 = vrot.lane.b32.xlu0 %v1882_v55, %s3877_s29  ;;  %v1888_v28 = vmul.f32 %v1884_v0, %v1882_v55 }
0x1512   :  { %1891 = vrot.lane.b32.xlu1 %v1881_v56, %s3877_s29  ;;  %v1887_v37 = vmul.f32 %v1883_v25, %v1881_v56 }
0x1583   :  { %v1894_v58 = vpop.permute.xlu0 %1893 }
0x1584   :  { %v1898_v61 = vmul.f32 %v1894_v58, %v1882_v55  ;;  %v1892_v62 = vpop.permute.xlu1 %1891 }
0x1585   :  { %v1897_v39 = vmul.f32 %v1892_v62, %v1881_v56 }
0x1586   :  { %1903 = vrot.lane.b32.xlu0 %v1898_v61, %s3879_s10 }
0x1587   :  { %1901 = vrot.lane.b32.xlu1 %v1897_v39, %s3879_s10 }
0x15f8   :  { %v1904_v2 = vpop.permute.xlu0 %1903 }
0x15f9   :  { %v4439_v4 = vadd.f32 %v1904_v2, %v1888_v28  ;;  %v1902_v1 = vpop.permute.xlu1 %1901 }
0x15fa   :  { %v4441_v60 = vadd.f32 %v1902_v1, %v1887_v37 }
0x15fb   :  { %3810 = vtanh.f32 %v4439_v4  ;;  %v1924_v5 = vrot.slane %v4439_v4, 3 }
0x15fc   :  { %3812 = vtanh.f32 %v4441_v60  ;;  %v1923_v63 = vrot.slane %v4441_v60, 4 }
0x15fe   :  { %v1925_v3 = vsel %vm298_vm1, %v1924_v5, %v1923_v63 }
0x1605   :  { %v3811_v6 = vpop.eup %3810 }
0x1606   :  { %v3813_v13 = vpop.eup %3812  ;;  %1915 = vrot.lane.b32.xlu0 %v3811_v6, %s3877_s29 }
0x1607   :  { %1913 = vrot.lane.b32.xlu1 %v3813_v13, %s3877_s29 }
0x160b   :  { %1926 = vrot.lane.b32.xlu1 %v1925_v3, %s3878_s2 }
0x1678   :  { %v1916_v8 = vpop.permute.xlu0 %1915 }
0x1679   :  { %v1920_v11 = vmul.f32 %v1916_v8, %v1882_v55  ;;  %v1914_v14 = vpop.permute.xlu1 %1913 }
0x167a   :  { %v1919_v17 = vmul.f32 %v1914_v14, %v1881_v56 }
0x167b   :  { %v2003_v19 = vrot.slane %v1920_v11, 3 }
0x167c   :  { %v2002_v20 = vrot.slane %v1919_v17, 4 }
0x167d   :  { %v1927_v22 = vpop.permute.xlu1 %1926 }
0x167e   :  { %3468 = vmatmul.mubr.msk.f32.vlgmr.msra.gmra.mrb[10].mxu0 %vm77_vm0, %v1927_v22  ;;  %v2004_v23 = vsel %vm298_vm1, %v2003_v19, %v2002_v20 }
0x167f   :  { %2005 = vrot.lane.b32.xlu0 %v2004_v23, %s3879_s10  ;;  %3654 = vmatpush3.bf16.msra.mxu0 %v4124_v49 }
0x1680   :  { %3655 = vmatprep.subr.bf16.mxu0 %v3874_v53  ;;  %3478 = vmatprep.mubr.msk.f32.mxu0 %vm3875_vm3, %v3876_v26 }
0x1683   :  { %3657 = vmatpush3.bf16.msra.mxu0 %v4144_v57 }
0x1684   :  { %3676 = vmatprep.subr.bf16.mxu0 %v3874_v53 }
0x16f1   :  { %v2006_v32 = vpop.permute.xlu0 %2005 }
0x16f2   :  { %3479 = vmatmul.mubr.msk.f32.vlgmr.msra.gmra.mrb[10].mxu0 %vm77_vm0, %v2006_v32  ;;  %3490 = vmatmul.mubr.msk.f32.vlgmr.msra.gmra.mrb[10].mxu1 %vm77_vm0, %v2006_v32 }
0x16f3   :  { %3666 = vmatpush3.bf16.msra.mxu1 %v4067_v21  ;;  %3500 = vmatprep.mubr.msk.f32.mxu1 %vm3875_vm3, %v3876_v26 }
0x16f4   :  { %3667 = vmatprep.subr.bf16.mxu1 %v3874_v53  ;;  %3678 = vmatpush3.bf16.msra.mxu0 %v4135_v54 }
0x16f5   :  { %3679 = vmatprep.subr.bf16.mxu0 %v3874_v53  ;;  %3522 = vmatprep.mubr.msk.f32.mxu0 %vm3875_vm3, %v3876_v26 }
0x16f7   :  { %3669 = vmatpush3.bf16.msra.mxu1 %v4077_v24 }
0x16f8   :  { %3670 = vmatprep.subr.bf16.mxu1 %v3874_v53  ;;  %3681 = vmatpush3.bf16.msra.mxu0 %v4148_v59 }
0x16f9   :  { %3682 = vmatprep.subr.bf16.mxu0 %v3874_v53 }
0x17c5   :  { %v2075_v29 = vpop.f32.mrb[10].mxu0  ;;  %v4474_v30 = vpop.f32.mrb[10].mxu1 }
0x17c6   :  { %v2086_v31 = vrot.slane %v2075_v29, %v4174_v7  ;;  %v3480_v34 = vpop.f32.mrb[11].mxu0  ;;  %v3491_v35 = vpop.f32.mrb[11].mxu1 }
0x17c8   :  { %v2087_v36 = vcombine.high %v2086_v31, %v2086_v31  ;;  %v2094_v38 = vrot.slane %v2086_v31, %v4174_v7 }
0x17ca   :  { %v2101_v43 = vrot.slane %v2087_v36, %v4174_v7  ;;  %v2105_v46 = vrot.slane %v2094_v38, %v4032_v44 }
0x17cc   :  { %v2109_v47 = vrot.slane %v2101_v43, %v4032_v44  ;;  %v2112_v48 = vadd.f32 %v2105_v46, %v3992_v12 }
0x17ce   :  { %v2113_v50 = vadd.f32 %v2109_v47, %v3990_v10  ;;  %3814 = vtanh.f32 %v2112_v48  ;;  %v2254_v48 = vrot.slane %v4474_v30, 3 }
0x17d0   :  { %3816 = vtanh.f32 %v2113_v50  ;;  %v2255_v50 = vrot.slane %v4474_v30, 4 }
0x17d8   :  { %v3815_v18 = vpop.eup %3814 }
0x17d9   :  { %v2116_v52 = vmul.f32 %v4401_v9, %v3815_v18 }
0x17da   :  { %v3817_v27 = vpop.eup %3816 }
0x17db   :  { %v2118_v55 = vsel %vm77_vm0, %v2116_v52, 0.0  ;;  %v2117_v56 = vmul.f32 %v4401_v9, %v3817_v27 }
0x17dc   :  { %2119 = vadd.xlane.f32.xlu1 %v2118_v55 }
0x17dd   :  { %v2121_v58 = vsel %vm77_vm0, %v2117_v56, 0.0 }
0x17de   :  { %2122 = vadd.xlane.f32.xlu0 %v2121_v58 }
0x1869   :  { %v2120_v61 = vpop.xlane.xlu1 %2119 }
0x186a   :  { %v2124_v62 = vmul.f32 1.442695, %v2120_v61 }
0x186b   :  { %v2123_v39 = vpop.xlane.xlu0 %2122 }
0x186c   :  { %3818 = vpow2.f32 %v2124_v62  ;;  %v2126_v0 = vmul.f32 1.442695, %v2123_v39 }
0x186e   :  { %3820 = vpow2.f32 %v2126_v0 }
0x1876   :  { %v3819_v25 = vpop.eup %3818 }
0x1877   :  { %v2133_v2 = vrot.slane %v3819_v25, %v4021_v33 }
0x1878   :  { %v3821_v28 = vpop.eup %3820 }
0x1879   :  { %v2137_v37 = vrot.slane %v3821_v28, %v4021_v33 }
0x187b   :  { %v2138_v1 = vsel %vm298_vm1, %v2137_v37, %v2133_v2  ;;  %v2266_v37 = vrot.slane %v4441_v60, 7 }
0x187c   :  { %v2140_v5 = vsel %vm301_vm2, %v2138_v1, 0.0 }
0x187d   :  { %2141 = vadd.xlane.f32.xlu0 %v2140_v5 }
0x190a   :  { %v2142_v63 = vpop.xlane.xlu0 %2141 }
0x190b   :  { %3822 = vrcp.f32 %v2142_v63 }
0x1915   :  { %v3823_v3 = vpop.eup %3822 }
0x1916   :  { %v2152_v6 = vrot.slane %v3823_v3, %v4035_v45  ;;  %v2148_v13 = vrot.slane %v3823_v3, %v4032_v44  ;;  %v2267_v3 = vrot.slane %v4439_v4, 7 }
0x1918   :  { %v2156_v8 = vmul.f32 %v3821_v28, %v2152_v6  ;;  %v2155_v11 = vmul.f32 %v3819_v25, %v2148_v13 }
0x191a   :  { %2164 = vperm.xlu0 %3723, %v2156_v8   ;;  %2159 = vperm.xlu1 %3722, %v2155_v11  }
0x1999   :  { %v2165_v14 = vpop.permute.xlu0 %2164  ;;  %v2160_v17 = vpop.permute.xlu1 %2159 }
0x199a   :  { %v2168_v19 = vmul.f32 %v4027_v41, %v2165_v14  ;;  %v2167_v20 = vmul.f32 %v2160_v17, %v4029_v42 }
0x199c   :  { %v2175_v22 = vrot.slane %v2168_v19, 4  ;;  %v2169_v23 = vrot.slane %v2167_v20, 4 }
0x199e   :  { %v2176_v32 = vadd.f32 %v2175_v22, %v2168_v19  ;;  %v2170_v29 = vadd.f32 %v2169_v23, %v2167_v20 }
0x19a0   :  { %v2177_v31 = vrot.slane %v2176_v32, 2  ;;  %v2171_v34 = vrot.slane %v2170_v29, 2 }
0x19a2   :  { %v2178_v35 = vadd.f32 %v2177_v31, %v2176_v32  ;;  %v2172_v36 = vadd.f32 %v2171_v34, %v2170_v29 }
0x19a4   :  { %v2179_v38 = vrot.slane %v2178_v35, 1  ;;  %v2173_v43 = vrot.slane %v2172_v36, 1 }
0x19a6   :  { %v2180_v46 = vadd.f32 %v2179_v38, %v2178_v35  ;;  %v2174_v47 = vadd.f32 %v2173_v43, %v2172_v36 }
0x19a8   :  { %v2182_v18 = vadd.f32 %v2180_v46, %v4055_v15  ;;  %v2181_v52 = vadd.f32 %v2174_v47, %v4057_v16 }
0x19aa   :  { %v2259_v27 = vadd.f32 %v2255_v50, %v2182_v18  ;;  %v2258_v55 = vadd.f32 %v2254_v48, %v2181_v52 }
0x19ac   :  { %3824 = vtanh.f32 %v2259_v27 }
0x19ad   :  { %3826 = vtanh.f32 %v2258_v55 }
0x19b6   :  { %v3825_v56 = vpop.eup %3824 }
0x19b7   :  { %v3827_v58 = vpop.eup %3826  ;;  %v2263_v39 = vmul.f32 %v4422_v51, %v3825_v56 }
0x19b8   :  { %v2262_v61 = vmul.f32 %v4422_v51, %v3827_v58 }
0x19b9   :  { %v2265_v30 = vadd.f32 %v4429_v40, %v2263_v39 }
0x19ba   :  { %v2264_v62 = vadd.f32 %v4429_v40, %v2262_v61 }
0x19bb   :  { %v2271_v6 = vmul.f32 %v2267_v3, %v2265_v30 }
0x19bc   :  { %2274 = vrot.lane.b32.xlu1 %v2264_v62, %s3877_s29  ;;  %v2270_v1 = vmul.f32 %v2266_v37, %v2264_v62 }
0x19c0   :  { %2276 = vrot.lane.b32.xlu1 %v2265_v30, %s3877_s29 }
0x1a2e   :  { %v2275_v0 = vpop.permute.xlu1 %2274 }
0x1a2f   :  { %v2280_v25 = vmul.f32 %v2275_v0, %v2264_v62 }
0x1a31   :  { %2284 = vrot.lane.b32.xlu0 %v2280_v25, %s3879_s10 }
0x1a32   :  { %v2277_v28 = vpop.permute.xlu1 %2276 }
0x1a33   :  { %v2281_v2 = vmul.f32 %v2277_v28, %v2265_v30 }
0x1a35   :  { %2286 = vrot.lane.b32.xlu1 %v2281_v2, %s3879_s10 }
0x1aa3   :  { %v2285_v5 = vpop.permute.xlu0 %2284 }
0x1aa4   :  { %v4508_v63 = vadd.f32 %v2285_v5, %v2270_v1 }
0x1aa6   :  { %3828 = vtanh.f32 %v4508_v63  ;;  %v2306_v11 = vrot.slane %v4508_v63, 5 }
0x1aa7   :  { %v2287_v13 = vpop.permute.xlu1 %2286 }
0x1aa8   :  { %v4512_v8 = vadd.f32 %v2287_v13, %v2271_v6 }
0x1aaa   :  { %3830 = vtanh.f32 %v4512_v8  ;;  %v2307_v14 = vrot.slane %v4512_v8, 4 }
0x1aac   :  { %v2308_v60 = vsel %vm298_vm1, %v2307_v14, %v2306_v11 }
0x1ab0   :  { %v3829_v17 = vpop.eup %3828 }
0x1ab1   :  { %2296 = vrot.lane.b32.xlu0 %v3829_v17, %s3877_s29 }
0x1ab4   :  { %v3831_v19 = vpop.eup %3830 }
0x1ab5   :  { %2298 = vrot.lane.b32.xlu1 %v3831_v19, %s3877_s29  ;;  %2309 = vrot.lane.b32.xlu0 %v2308_v60, %s3878_s2 }
0x1b23   :  { %v2297_v4 = vpop.permute.xlu0 %2296 }
0x1b24   :  { %v2302_v20 = vmul.f32 %v2297_v4, %v2264_v62 }
0x1b26   :  { %v2385_v29 = vrot.slane %v2302_v20, 5 }
0x1b27   :  { %v2299_v22 = vpop.permute.xlu1 %2298  ;;  %v2310_v23 = vpop.permute.xlu0 %2309 }
0x1b28   :  { %v2303_v32 = vmul.f32 %v2299_v22, %v2265_v30  ;;  %3501 = vmatmul.mubr.msk.f32.vlgmr.msra.gmra.mrb[12].mxu1 %vm77_vm0, %v2310_v23 }
0x1b29   :  { %3672 = vmatpush3.bf16.msra.mxu1 %v4124_v49  ;;  %3511 = vmatprep.mubr.msk.f32.mxu1 %vm3875_vm3, %v3876_v26 }
0x1b2a   :  { %v2386_v31 = vrot.slane %v2303_v32, 4  ;;  %3673 = vmatprep.subr.bf16.mxu1 %v3874_v53 }
0x1b2c   :  { %v2387_v34 = vsel %vm298_vm1, %v2386_v31, %v2385_v29 }
0x1b2d   :  { %2388 = vrot.lane.b32.xlu1 %v2387_v34, %s3879_s10  ;;  %3675 = vmatpush3.bf16.msra.mxu1 %v4144_v57 }
0x1b2e   :  { %3694 = vmatprep.subr.bf16.mxu1 %v3874_v53 }
0x1b9f   :  { %v2389_v35 = vpop.permute.xlu1 %2388 }
0x1ba0   :  { %3512 = vmatmul.mubr.msk.f32.vlgmr.msra.gmra.mrb[12].mxu1 %vm77_vm0, %v2389_v35  ;;  %3523 = vmatmul.mubr.msk.f32.vlgmr.msra.gmra.mrb[12].mxu0 %vm77_vm0, %v2389_v35 }
0x1ba1   :  { %3684 = vmatpush3.bf16.msra.mxu0 %v4067_v21  ;;  %3533 = vmatprep.mubr.msk.f32.mxu0 %vm3875_vm3, %v3876_v26 }
0x1ba2   :  { %3685 = vmatprep.subr.bf16.mxu0 %v3874_v53  ;;  %3696 = vmatpush3.bf16.msra.mxu1 %v4135_v54 }
0x1ba3   :  { %3697 = vmatprep.subr.bf16.mxu1 %v3874_v53  ;;  %3555 = vmatprep.mubr.msk.f32.mxu1 %vm3875_vm3, %v3876_v26 }
0x1ba5   :  { %3687 = vmatpush3.bf16.msra.mxu0 %v4077_v24 }
0x1ba6   :  { %3688 = vmatprep.subr.bf16.mxu0 %v3874_v53  ;;  %3699 = vmatpush3.bf16.msra.mxu1 %v4148_v59 }
0x1c73   :  { %v2458_v36 = vpop.f32.mrb[12].mxu1  ;;  %v4543_v21 = vpop.f32.mrb[12].mxu0 }
0x1c74   :  { %v2469_v38 = vrot.slane %v2458_v36, %v4174_v7  ;;  %v3513_v43 = vpop.f32.mrb[13].mxu1  ;;  %v3524_v46 = vpop.f32.mrb[13].mxu0 }
0x1c76   :  { %v2470_v47 = vcombine.high %v2469_v38, %v2469_v38  ;;  %v2477_v54 = vrot.slane %v2469_v38, %v4174_v7 }
0x1c78   :  { %v2484_v48 = vrot.slane %v2470_v47, %v4174_v7  ;;  %v2488_v50 = vrot.slane %v2477_v54, %v4032_v44  ;;  %v2637_v54 = vrot.slane %v4543_v21, 2 }
0x1c7a   :  { %v2492_v24 = vrot.slane %v2484_v48, %v4032_v44  ;;  %v2495_v18 = vadd.f32 %v2488_v50, %v3992_v12  ;;  %v2638_v48 = vrot.slane %v4543_v21, 3 }
0x1c7c   :  { %v2496_v59 = vadd.f32 %v2492_v24, %v3990_v10  ;;  %3832 = vtanh.f32 %v2495_v18 }
0x1c7e   :  { %3834 = vtanh.f32 %v2496_v59 }
0x1c86   :  { %v3833_v52 = vpop.eup %3832 }
0x1c87   :  { %v2499_v27 = vmul.f32 %v4401_v9, %v3833_v52 }
0x1c88   :  { %v3835_v55 = vpop.eup %3834 }
0x1c89   :  { %v2501_v56 = vsel %vm77_vm0, %v2499_v27, 0.0  ;;  %v2500_v58 = vmul.f32 %v4401_v9, %v3835_v55 }
0x1c8a   :  { %2502 = vadd.xlane.f32.xlu0 %v2501_v56 }
0x1c8b   :  { %v2504_v61 = vsel %vm77_vm0, %v2500_v58, 0.0 }
0x1c8c   :  { %2505 = vadd.xlane.f32.xlu1 %v2504_v61 }
0x1d17   :  { %v2503_v62 = vpop.xlane.xlu0 %2502 }
0x1d18   :  { %v2507_v39 = vmul.f32 1.442695, %v2503_v62 }
0x1d19   :  { %v2506_v30 = vpop.xlane.xlu1 %2505 }
0x1d1a   :  { %3836 = vpow2.f32 %v2507_v39  ;;  %v2509_v0 = vmul.f32 1.442695, %v2506_v30 }
0x1d1c   :  { %3838 = vpow2.f32 %v2509_v0  ;;  %v2650_v0 = vrot.slane %v4512_v8, 7 }
0x1d24   :  { %v3837_v25 = vpop.eup %3836 }
0x1d25   :  { %v2516_v2 = vrot.slane %v3837_v25, %v4021_v33 }
0x1d26   :  { %v3839_v28 = vpop.eup %3838 }
0x1d27   :  { %v2520_v37 = vrot.slane %v3839_v28, %v4021_v33 }
0x1d29   :  { %v2521_v1 = vsel %vm298_vm1, %v2520_v37, %v2516_v2 }
0x1d2a   :  { %v2523_v5 = vsel %vm301_vm2, %v2521_v1, 0.0 }
0x1d2b   :  { %2524 = vadd.xlane.f32.xlu0 %v2523_v5 }
0x1db8   :  { %v2525_v3 = vpop.xlane.xlu0 %2524 }
0x1db9   :  { %3840 = vrcp.f32 %v2525_v3 }
0x1dc3   :  { %v3841_v6 = vpop.eup %3840 }
0x1dc4   :  { %v2535_v13 = vrot.slane %v3841_v6, %v4035_v45  ;;  %v2531_v11 = vrot.slane %v3841_v6, %v4032_v44 }
0x1dc6   :  { %v2539_v14 = vmul.f32 %v3839_v28, %v2535_v13  ;;  %v2538_v60 = vmul.f32 %v3837_v25, %v2531_v11  ;;  %v2649_v25 = vrot.slane %v4508_v63, 7 }
0x1dc8   :  { %2547 = vperm.xlu1 %3722, %v2539_v14   ;;  %2542 = vperm.xlu0 %3723, %v2538_v60  }
0x1e47   :  { %v2548_v17 = vpop.permute.xlu1 %2547  ;;  %v2543_v19 = vpop.permute.xlu0 %2542 }
0x1e48   :  { %v2551_v4 = vmul.f32 %v4027_v41, %v2548_v17  ;;  %v2550_v20 = vmul.f32 %v2543_v19, %v4029_v42 }
0x1e4a   :  { %v2558_v22 = vrot.slane %v2551_v4, 4  ;;  %v2552_v23 = vrot.slane %v2550_v20, 4 }
0x1e4c   :  { %v2559_v32 = vadd.f32 %v2558_v22, %v2551_v4  ;;  %v2553_v29 = vadd.f32 %v2552_v23, %v2550_v20 }
0x1e4e   :  { %v2560_v31 = vrot.slane %v2559_v32, 2  ;;  %v2554_v34 = vrot.slane %v2553_v29, 2 }
0x1e50   :  { %v2561_v35 = vadd.f32 %v2560_v31, %v2559_v32  ;;  %v2555_v36 = vadd.f32 %v2554_v34, %v2553_v29 }
0x1e52   :  { %v2562_v38 = vrot.slane %v2561_v35, 1  ;;  %v2556_v43 = vrot.slane %v2555_v36, 1 }
0x1e54   :  { %v2563_v46 = vadd.f32 %v2562_v38, %v2561_v35  ;;  %v2557_v47 = vadd.f32 %v2556_v43, %v2555_v36 }
0x1e56   :  { %v2565_v50 = vadd.f32 %v2563_v46, %v4055_v15  ;;  %v2564_v24 = vadd.f32 %v2557_v47, %v4057_v16 }
0x1e58   :  { %v2642_v18 = vadd.f32 %v2638_v48, %v2565_v50  ;;  %v2641_v59 = vadd.f32 %v2637_v54, %v2564_v24 }
0x1e5a   :  { %3842 = vtanh.f32 %v2642_v18 }
0x1e5b   :  { %3844 = vtanh.f32 %v2641_v59 }
0x1e64   :  { %v3843_v52 = vpop.eup %3842 }
0x1e65   :  { %v3845_v27 = vpop.eup %3844  ;;  %v2646_v55 = vmul.f32 %v4422_v51, %v3843_v52 }
0x1e66   :  { %v2645_v56 = vmul.f32 %v4422_v51, %v3845_v27 }
0x1e67   :  { %v2648_v58 = vadd.f32 %v4429_v40, %v2646_v55 }
0x1e68   :  { %v2647_v61 = vadd.f32 %v4429_v40, %v2645_v56 }
0x1e69   :  { %2659 = vrot.lane.b32.xlu0 %v2648_v58, %s3877_s29  ;;  %v2654_v28 = vmul.f32 %v2650_v0, %v2648_v58 }
0x1e6a   :  { %2657 = vrot.lane.b32.xlu1 %v2647_v61, %s3877_s29  ;;  %v2653_v37 = vmul.f32 %v2649_v25, %v2647_v61 }
0x1edb   :  { %v2660_v21 = vpop.permute.xlu0 %2659 }
0x1edc   :  { %v2664_v62 = vmul.f32 %v2660_v21, %v2648_v58  ;;  %v2658_v39 = vpop.permute.xlu1 %2657 }
0x1edd   :  { %v2663_v30 = vmul.f32 %v2658_v39, %v2647_v61 }
0x1ede   :  { %2669 = vrot.lane.b32.xlu0 %v2664_v62, %s3879_s10 }
0x1edf   :  { %2667 = vrot.lane.b32.xlu1 %v2663_v30, %s3879_s10 }
0x1f50   :  { %v2670_v2 = vpop.permute.xlu0 %2669 }
0x1f51   :  { %v4578_v1 = vadd.f32 %v2670_v2, %v2654_v28  ;;  %v2668_v5 = vpop.permute.xlu1 %2667 }
0x1f52   :  { %v4580_v3 = vadd.f32 %v2668_v5, %v2653_v37 }
0x1f53   :  { %3846 = vtanh.f32 %v4578_v1  ;;  %v2690_v6 = vrot.slane %v4578_v1, 5 }
0x1f54   :  { %3848 = vtanh.f32 %v4580_v3  ;;  %v2689_v13 = vrot.slane %v4580_v3, 6 }
0x1f56   :  { %v2691_v8 = vsel %vm298_vm1, %v2690_v6, %v2689_v13 }
0x1f5d   :  { %v3847_v11 = vpop.eup %3846 }
0x1f5e   :  { %v3849_v63 = vpop.eup %3848  ;;  %2681 = vrot.lane.b32.xlu0 %v3847_v11, %s3877_s29 }
0x1f5f   :  { %2679 = vrot.lane.b32.xlu1 %v3849_v63, %s3877_s29 }
0x1f63   :  { %2692 = vrot.lane.b32.xlu1 %v2691_v8, %s3878_s2 }
0x1fd0   :  { %v2682_v14 = vpop.permute.xlu0 %2681 }
0x1fd1   :  { %v2686_v60 = vmul.f32 %v2682_v14, %v2648_v58  ;;  %v2680_v17 = vpop.permute.xlu1 %2679 }
0x1fd2   :  { %v2685_v19 = vmul.f32 %v2680_v17, %v2647_v61 }
0x1fd3   :  { %v2769_v4 = vrot.slane %v2686_v60, 5 }
0x1fd4   :  { %v2768_v20 = vrot.slane %v2685_v19, 6 }
0x1fd5   :  { %v2693_v22 = vpop.permute.xlu1 %2692 }
0x1fd6   :  { %3534 = vmatmul.mubr.msk.f32.vlgmr.msra.gmra.mrb[14].mxu0 %vm77_vm0, %v2693_v22  ;;  %v2770_v23 = vsel %vm298_vm1, %v2769_v4, %v2768_v20 }
0x1fd7   :  { %2771 = vrot.lane.b32.xlu0 %v2770_v23, %s3879_s10  ;;  %3690 = vmatpush3.bf16.msra.mxu0 %v4124_v49 }
0x1fd8   :  { %3691 = vmatprep.subr.bf16.mxu0 %v3874_v53  ;;  %3544 = vmatprep.mubr.msk.f32.mxu0 %vm3875_vm3, %v3876_v26 }
0x1fdb   :  { %3693 = vmatpush3.bf16.msra.mxu0 %v4144_v57 }
0x2049   :  { %v2772_v32 = vpop.permute.xlu0 %2771 }
0x204a   :  { %3545 = vmatmul.mubr.msk.f32.vlgmr.msra.gmra.mrb[14].mxu0 %vm77_vm0, %v2772_v32  ;;  %3556 = vmatmul.mubr.msk.f32.vlgmr.msra.gmra.mrb[14].mxu1 %vm77_vm0, %v2772_v32 }
0x211d   :  { %v2841_v29 = vpop.f32.mrb[14].mxu0  ;;  %v4600_v31 = vpop.f32.mrb[14].mxu1 }
0x211e   :  { %v2852_v34 = vrot.slane %v2841_v29, %v4174_v7  ;;  %v3546_v35 = vpop.f32.mrb[15].mxu0  ;;  %v3557_v36 = vpop.f32.mrb[15].mxu1  ;;  %v3020_v19 = vrot.slane %v4600_v31, 1  ;;  %v3021_v4 = vrot.slane %v4600_v31, 2 }
0x2120   :  { %v2853_v49 = vcombine.high %v2852_v34, %v2852_v34  ;;  %v2860_v53 = vrot.slane %v2852_v34, %v4174_v7 }
0x2122   :  { %v2867_v38 = vrot.slane %v2853_v49, %v4174_v7  ;;  %v2871_v26 = vrot.slane %v2860_v53, %v4032_v44  ;;  %v3033_v53 = vrot.slane %v4578_v1, 7 }
0x2124   :  { %v2875_v57 = vrot.slane %v2867_v38, %v4032_v44  ;;  %v2878_v43 = vadd.f32 %v2871_v26, %v3992_v12 }
0x2126   :  { %v2879_v46 = vadd.f32 %v2875_v57, %v3990_v10  ;;  %3850 = vtanh.f32 %v2878_v43 }
0x2128   :  { %3852 = vtanh.f32 %v2879_v46 }
0x2130   :  { %v3851_v47 = vpop.eup %3850 }
0x2131   :  { %v2882_v54 = vmul.f32 %v4401_v9, %v3851_v47 }
0x2132   :  { %v3853_v48 = vpop.eup %3852 }
0x2133   :  { %v2884_v50 = vsel %vm77_vm0, %v2882_v54, 0.0  ;;  %v2883_v24 = vmul.f32 %v4401_v9, %v3853_v48  ;;  %v3185_v54 = vld [vmem:[%s4681_s13] ss:$0 sm:$0xff] }
0x2134   :  { %2885 = vadd.xlane.f32.xlu1 %v2884_v50 }
0x2135   :  { %v2887_v7 = vsel %vm77_vm0, %v2883_v24, 0.0 }
0x2136   :  { %2888 = vadd.xlane.f32.xlu0 %v2887_v7 }
0x21c1   :  { %v2886_v18 = vpop.xlane.xlu1 %2885 }
0x21c2   :  { %v2890_v59 = vmul.f32 1.442695, %v2886_v18 }
0x21c3   :  { %v2889_v52 = vpop.xlane.xlu0 %2888 }
0x21c4   :  { %3854 = vpow2.f32 %v2890_v59  ;;  %v2892_v12 = vmul.f32 1.442695, %v2889_v52 }
0x21c6   :  { %3856 = vpow2.f32 %v2892_v12 }
0x21ce   :  { %v3855_v10 = vpop.eup %3854 }
0x21cf   :  { %v2899_v55 = vrot.slane %v3855_v10, %v4021_v33 }
0x21d0   :  { %v3857_v27 = vpop.eup %3856 }
0x21d1   :  { %v2903_v56 = vrot.slane %v3857_v27, %v4021_v33 }
0x21d3   :  { %v2904_v58 = vsel %vm298_vm1, %v2903_v56, %v2899_v55  ;;  %v3872_v55 = vld [vmem:[%s4669_s0] sm:$0xff] }
0x21d4   :  { %v2906_v9 = vsel %vm301_vm2, %v2904_v58, 0.0 }
0x21d5   :  { %2907 = vadd.xlane.f32.xlu0 %v2906_v9 }
0x2262   :  { %v2908_v61 = vpop.xlane.xlu0 %2907 }
0x2263   :  { %3858 = vrcp.f32 %v2908_v61 }
0x226d   :  { %v3859_v21 = vpop.eup %3858 }
0x226e   :  { %v2918_v62 = vrot.slane %v3859_v21, %v4035_v45  ;;  %v2914_v39 = vrot.slane %v3859_v21, %v4032_v44 }
0x2270   :  { %v2922_v30 = vmul.f32 %v3857_v27, %v2918_v62  ;;  %v2921_v0 = vmul.f32 %v3855_v10, %v2914_v39 }
0x2272   :  { %2930 = vperm.xlu1 %3722, %v2922_v30   ;;  %2925 = vperm.xlu0 %3723, %v2921_v0  }
0x22f1   :  { %v2931_v25 = vpop.permute.xlu1 %2930  ;;  %v4619_v28 = vpop.permute.xlu0 %2925 }
0x22f2   :  { %v2934_v33 = vmul.f32 %v4027_v41, %v2931_v25  ;;  %v2933_v2 = vmul.f32 %v4619_v28, %v4029_v42  ;;  %v3070_v56 = vmul.f32 %v3872_v55, %v4619_v28  ;;  %v3186_v28 = vld [vmem:[%s4682_s14] ss:$0 sm:$0xff] }
0x22f4   :  { %v2941_v37 = vrot.slane %v2934_v33, 4  ;;  %v2935_v5 = vrot.slane %v2933_v2, 4  ;;  %v3072_v9 = vsel %vm77_vm0, %v3070_v56, 0.0 }
0x22f5   :  { %v3073_v21 = vrot.slane %v3072_v9, 4 }
0x22f6   :  { %v2942_v6 = vadd.f32 %v2941_v37, %v2934_v33  ;;  %v2936_v13 = vadd.f32 %v2935_v5, %v2933_v2 }
0x22f7   :  { %v3074_v39 = vadd.f32 %v3073_v21, %v3072_v9 }
0x22f8   :  { %v2943_v8 = vrot.slane %v2942_v6, 2  ;;  %v2937_v45 = vrot.slane %v2936_v13, 2 }
0x22f9   :  { %v3075_v0 = vrot.slane %v3074_v39, 2 }
0x22fa   :  { %v2944_v11 = vadd.f32 %v2943_v8, %v2942_v6  ;;  %v2938_v44 = vadd.f32 %v2937_v45, %v2936_v13 }
0x22fb   :  { %v3076_v33 = vadd.f32 %v3075_v0, %v3074_v39 }
0x22fc   :  { %v2945_v63 = vrot.slane %v2944_v11, 1  ;;  %v2939_v14 = vrot.slane %v2938_v44, 1 }
0x22fd   :  { %v3077_v37 = vrot.slane %v3076_v33, 1 }
0x22fe   :  { %v2946_v60 = vadd.f32 %v2945_v63, %v2944_v11  ;;  %v2940_v17 = vadd.f32 %v2939_v14, %v2938_v44  ;;  %v21_v44 = vstv %s4683_s15 }
0x22ff   :  { %v3078_v6 = vadd.f32 %v3077_v37, %v3076_v33  ;;  %22 = vst [vmem:[#allocation2] sm:$0x1] %v21_v44 }
0x2300   :  { %v2948_v41 = vadd.f32 %v2946_v60, %v4055_v15  ;;  %v2947_v42 = vadd.f32 %v2940_v17, %v4057_v16 }
0x2301   :  { %v3121_v8 = vmul.f32 %v3186_v28, %v3078_v6 }
0x2302   :  { %v3025_v20 = vadd.f32 %v3021_v4, %v2948_v41  ;;  %v3024_v22 = vadd.f32 %v3020_v19, %v2947_v42 }
0x2304   :  { %3860 = vtanh.f32 %v3025_v20 }
0x2305   :  { %3862 = vtanh.f32 %v3024_v22 }
0x2306   :  { %v3187_v41 = vld [vmem:[#allocation2] ss:$0 sm:$0xff] }
0x230e   :  { %v3861_v23 = vpop.eup %3860 }
0x230f   :  { %v3863_v32 = vpop.eup %3862  ;;  %v3029_v29 = vmul.f32 %v4422_v51, %v3861_v23 }
0x2310   :  { %v3028_v35 = vmul.f32 %v4422_v51, %v3863_v32  ;;  %v3032_v51 = vrot.slane %v4580_v3, 7  ;;  %v3871_v3 = vld [vmem:[%s4669_s0 + $0x8] sm:$0xff] }
0x2311   :  { %v3031_v34 = vadd.f32 %v4429_v40, %v3029_v29  ;;  %v3071_v50 = vmul.f32 %v3871_v3, %v2931_v25 }
0x2312   :  { %v3030_v31 = vadd.f32 %v4429_v40, %v3028_v35 }
0x2313   :  { %3042 = vrot.lane.b32.xlu1 %v3031_v34, %s3877_s29  ;;  %v3037_v38 = vmul.f32 %v3033_v53, %v3031_v34  ;;  %v3079_v12 = vsel %vm77_vm0, %v3071_v50, 0.0 }
0x2314   :  { %v3036_v43 = vmul.f32 %v3032_v51, %v3030_v31  ;;  %v3080_v58 = vrot.slane %v3079_v12, 4 }
0x2316   :  { %v3081_v61 = vadd.f32 %v3080_v58, %v3079_v12 }
0x2317   :  { %3040 = vrot.lane.b32.xlu1 %v3030_v31, %s3877_s29 }
0x2318   :  { %v3082_v62 = vrot.slane %v3081_v61, 2 }
0x231a   :  { %v3083_v30 = vadd.f32 %v3082_v62, %v3081_v61 }
0x231c   :  { %v3084_v25 = vrot.slane %v3083_v30, 1 }
0x231e   :  { %v3085_v2 = vadd.f32 %v3084_v25, %v3083_v30 }
0x2320   :  { %v3122_v5 = vmul.f32 %v3186_v28, %v3085_v2 }
0x2322   :  { %v3125_v13 = vrot.slane %v3122_v5, 7 }
0x2324   :  { %v3126_v45 = vsel %vm298_vm1, %v3125_v13, %v3121_v8 }
0x2325   :  { %v3129_v11 = vsel %vm3128_vm4, %v3126_v45, 0.0 }
0x2385   :  { %v3043_v15 = vpop.permute.xlu1 %3042 }
0x2386   :  { %v3047_v16 = vmul.f32 %v3043_v15, %v3031_v34 }
0x2388   :  { %3052 = vrot.lane.b32.xlu0 %v3047_v16, %s3879_s10 }
0x2389   :  { %v3041_v36 = vpop.permute.xlu1 %3040 }
0x238a   :  { %v3046_v49 = vmul.f32 %v3041_v36, %v3030_v31 }
0x238c   :  { %3050 = vrot.lane.b32.xlu1 %v3046_v49, %s3879_s10 }
0x23fa   :  { %v3053_v26 = vpop.permute.xlu0 %3052 }
0x23fb   :  { %v3057_v57 = vadd.f32 %v3053_v26, %v3037_v38 }
0x23fd   :  { %3864 = vtanh.f32 %v3057_v57 }
0x23fe   :  { %v3051_v40 = vpop.permute.xlu1 %3050 }
0x23ff   :  { %v3056_v46 = vadd.f32 %v3051_v40, %v3036_v43 }
0x2401   :  { %3866 = vtanh.f32 %v3056_v46 }
0x2407   :  { %v3865_v47 = vpop.eup %3864 }
0x2408   :  { %3064 = vrot.lane.b32.xlu0 %v3865_v47, %s3877_s29 }
0x240b   :  { %v3867_v48 = vpop.eup %3866 }
0x240c   :  { %3062 = vrot.lane.b32.xlu1 %v3867_v48, %s3877_s29  ;;  %3092 = vrot.lane.b32.xlu0 %v3185_v54, %s3878_s2 }
0x247a   :  { %v3065_v1 = vpop.permute.xlu0 %3064 }
0x247b   :  { %v3069_v24 = vmul.f32 %v3065_v1, %v3031_v34 }
0x247e   :  { %v3063_v7 = vpop.permute.xlu1 %3062  ;;  %v3093_v18 = vpop.permute.xlu0 %3092 }
0x247f   :  { %v3068_v59 = vmul.f32 %v3063_v7, %v3030_v31  ;;  %v3096_v52 = vmul.f32 %v3093_v18, %v3069_v24 }
0x2481   :  { %v3095_v10 = vmul.f32 %v3093_v18, %v3068_v59  ;;  %v3099_v27 = vrot.slane %v3096_v52, 7 }
0x2483   :  { %3102 = vrot.lane.b32.xlu0 %v3099_v27, %s3879_s10  ;;  %3100 = vrot.lane.b32.xlu1 %v3095_v10, %s3879_s10 }
0x24a7   :  { %3130 = vadd.xlane.f32.xlu1 %v3129_v11 }
0x24f5   :  { %v3101_v63 = vpop.permute.xlu1 %3100  ;;  %v3103_v60 = vpop.permute.xlu0 %3102 }
0x24f6   :  { %v3107_v14 = vsel %vm3106_vm5, %v3101_v63, 0.0  ;;  %v3111_v17 = vsel %vm3110_vm6, %v3103_v60, 0.0 }
0x24f7   :  { %3108 = vadd.xlane.f32.xlu0 %v3107_v14 }
0x24fb   :  { %3112 = vadd.xlane.f32.xlu0 %v3111_v17 }
0x2534   :  { %v3131_v19 = vpop.xlane.xlu1 %3130 }
0x2535   :  { %v3133_v4 = vrot.slane %v3131_v19, 1 }
0x2584   :  { %v3109_v42 = vpop.xlane.xlu0 %3108 }
0x2585   :  { %v3135_v20 = vadd.f32 %v3133_v4, %v3109_v42 }
0x2587   :  { %v3144_v22 = vadd.f32 %v3187_v41, %v3135_v20 }
0x2588   :  { %v3113_v23 = vpop.xlane.xlu0 %3112 }
0x2589   :  { %3147 = vst.msk [vmem:[%s4684_s16 - $0x7] sm:$0x80] %vm3146_vm7, %v3144_v22  ;;  %v3136_v32 = vadd.f32 %v3133_v4, %v3113_v23 }
0x258b   :  { %v3145_v29 = vadd.f32 %v3187_v41, %v3136_v32 }
0x258d   :  { %3149 = vst.msk [vmem:[%s4684_s16 + $0x1] sm:$0x1] %vm3148_vm8, %v3145_v29 }

</bundles_post_ra>
